<compile_context>
chip_gen: v7x
topology: tpu7x:2x2x1
jax: 0.10.0
libtpu: 0.0.40
codegen_flags: <defaults>
</compile_context>

<pallas_src>
import functools

import numpy as np
import jax
import jax.numpy as jnp
from jax import lax
from jax.experimental import pallas as pl
from jax.experimental.pallas import tpu as pltpu


def injector_kernel(qr_ref, f_ref, pvec_ref, const_ref, wv_ref, wofa_ref,
                    wout_ref, out_ref, *, n_heads, n_points, spatial_shapes,
                    level_start, len_q, len_in):
    f32 = jnp.float32
    H, P = n_heads, n_points
    L = len(spatial_shapes)
    Lq, Lin = len_q, len_in
    D = wv_ref.shape[0]
    hd = D // H
    LP = L * P
    LPH = LP * H
    eps = 1e-6  # norm_layer = LayerNorm(eps=1e-6)

    qr = qr_ref[...].astype(f32)            # (Lq, D + 2L) = [query | ref points]
    q = qr[:, 0:D]
    refp = qr[:, D:D + 2 * L]               # interleaved (x, y) per level
    f = f_ref[...].astype(f32)              # (Lin, D)

    # Packed small parameters (one VMEM tile instead of 9 tiny inputs).
    qn_w = pvec_ref[0:1, 0:D]
    qn_b = pvec_ref[1:2, 0:D]
    fn_w = pvec_ref[2:3, 0:D]
    fn_b = pvec_ref[3:4, 0:D]
    bv = pvec_ref[4:5, 0:D]
    bout = pvec_ref[5:6, 0:D]
    gamma = pvec_ref[6:7, 0:D]
    bofa = pvec_ref[7:8, 0:3 * LPH]

    def layernorm(x, w, b):
        mu = jnp.mean(x, axis=-1, keepdims=True)
        var = jnp.mean((x - mu) ** 2, axis=-1, keepdims=True)
        return (x - mu) * lax.rsqrt(var + eps) * w + b

    q_n = layernorm(q, qn_w, qn_b)          # self.query_norm(query)
    f_n = layernorm(f, fn_w, fn_b)          # self.feat_norm(feat)

    value = jnp.dot(f_n, wv_ref[...], preferred_element_type=f32) + bv   # (Lin, D)
    oa = jnp.dot(q_n, wofa_ref[...], preferred_element_type=f32) + bofa  # (Lq, 3*LPH)
    # oa columns: [0, 2*LPH)   sampling offsets, layout [(l,p)][x|y][h]
    #             [2*LPH, ...) attention logits,  layout [(l,p)][h]

    # Per-head softmax numerators + denominators (normalization deferred to a
    # per-head division after the value contraction).  Per-head max avoids the
    # global-max underflow hazard.
    alog = oa[:, 2 * LPH:3 * LPH]
    maxh = alog[:, 0:H]
    for i in range(1, LP):
        maxh = jnp.maximum(maxh, alog[:, i * H:(i + 1) * H])
    e_blocks = [jnp.exp(alog[:, i * H:(i + 1) * H] - maxh) for i in range(LP)]
    denom = e_blocks[0]
    for i in range(1, LP):
        denom = denom + e_blocks[i]                                       # (Lq, H)

    y_heads = [None] * H
    for l in range(L):
        Hl, Wl = spatial_shapes[l]
        HW = Hl * Wl
        start = level_start[l]
        cbase = l * (H + 2)
        # Host-precomputed constants for this level.
        eb = const_ref[cbase:cbase + H, 0:H * HW]              # head indicator (H, H*HW)
        col = const_ref[cbase + H:cbase + H + 1, 0:H * HW]     # pixel-center x (1, H*HW)
        row = const_ref[cbase + H + 1:cbase + H + 2, 0:H * HW]  # pixel-center y

        # grid_sample(align_corners=False): x_pix = (ref + off/W)*W - 0.5
        ref_x = refp[:, 2 * l:2 * l + 1] * Wl - 0.5            # (Lq, 1)
        ref_y = refp[:, 2 * l + 1:2 * l + 2] * Hl - 0.5

        # ONE fused broadcast matmul per level: row-stack every point's
        # (x-offset, y-offset, exp-attention) head vectors and broadcast each
        # head scalar across its HW lane block in a single MXU push.
        off0 = l * P * 2 * H
        pieces = []
        for p in range(P):
            o0 = off0 + p * 2 * H
            pieces.append(oa[:, o0:o0 + H])            # x offsets   (Lq, H)
            pieces.append(oa[:, o0 + H:o0 + 2 * H])    # y offsets   (Lq, H)
            pieces.append(e_blocks[l * P + p])         # exp(logits) (Lq, H)
        stack = jnp.concatenate(pieces, axis=0)        # (3*P*Lq, H)
        bcast = jnp.dot(stack, eb, preferred_element_type=f32)  # (3*P*Lq, H*HW)

        # Dense bilinear "tent" weights for all heads, attention folded in.
        w_all = None
        for p in range(P):
            r0 = 3 * p * Lq
            xb = bcast[r0:r0 + Lq, :]
            yb = bcast[r0 + Lq:r0 + 2 * Lq, :]
            ab = bcast[r0 + 2 * Lq:r0 + 3 * Lq, :]
            wx = jnp.maximum(0.0, 1.0 - jnp.abs(ref_x + xb - col))
            wy = jnp.maximum(0.0, 1.0 - jnp.abs(ref_y + yb - row))
            term = ab * wx * wy
            w_all = term if w_all is None else w_all + term    # (Lq, H*HW)

        # Per-head value contraction (no replicated block-diagonal tile).
        v_l = value[start:start + HW, :]                       # (HW, D)
        for h in range(H):
            contrib = jnp.dot(w_all[:, h * HW:(h + 1) * HW],
                              v_l[:, h * hd:(h + 1) * hd],
                              preferred_element_type=f32)      # (Lq, hd)
            y_heads[h] = contrib if y_heads[h] is None else y_heads[h] + contrib

    # Deferred per-head softmax normalization, head concat, output projection.
    inv_den = pl.reciprocal(denom, approx=False)               # (Lq, H)
    y = jnp.concatenate([y_heads[h] * inv_den[:, h:h + 1] for h in range(H)],
                        axis=1)                                # (Lq, D)
    attn = jnp.dot(y, wout_ref[...], preferred_element_type=f32) + bout

    # Injector residual:  query + gamma * attn
    out_ref[...] = (q + gamma * attn).astype(out_ref.dtype)


def injector_forward(query, reference_points, feat, spatial_shapes,
                     level_start_index, params, *, n_heads, n_points):
    B, Lq, D = query.shape
    Lin = feat.shape[1]
    ss = tuple((int(h), int(w)) for h, w in np.asarray(spatial_shapes))
    ls = tuple(int(s) for s in np.asarray(level_start_index))
    L = len(ss)
    H, P = n_heads, n_points
    LPH = L * P * H
    assert D % H == 0
    assert Lq % 8 == 0 and Lin % 8 == 0

    # Tokens-major 2-D views; reference points folded into the query block.
    q2d = query.reshape(B * Lq, D)
    ref2d = reference_points.reshape(B * Lq, L * 2).astype(query.dtype)
    qr2d = jnp.concatenate([q2d, ref2d], axis=1)               # (B*Lq, D + 2L)
    f2d = feat.reshape(B * Lin, D)

    # ---- parameter repacking (cheap, parameter-only) -------------------------
    # Permute woff/wa columns so each (level, point) block is a contiguous
    # per-head slice inside the kernel, and fuse them into one projection.
    idx_off = np.array([((h * L + l) * P + p) * 2 + c
                        for l in range(L) for p in range(P)
                        for c in range(2) for h in range(H)], dtype=np.int32)
    idx_a = np.array([(h * L + l) * P + p
                      for l in range(L) for p in range(P) for h in range(H)],
                     dtype=np.int32)
    wofa = jnp.concatenate([params["woff"][:, idx_off],
                            params["wa"][:, idx_a]], axis=1).astype(jnp.float32)
    bofa = jnp.concatenate([params["boff"][:, idx_off],
                            params["ba"][:, idx_a]], axis=1).astype(jnp.float32)

    # Pack all (1, N) params into a single small input tile.
    Wmax = max(D, 3 * LPH)
    pvec_np = np.zeros((8, Wmax), np.float32)
    for r, name in enumerate(["qn_w", "qn_b", "fn_w", "fn_b", "bv", "bout",
                              "gamma"]):
        pvec_np[r, :D] = np.asarray(params[name], np.float32).reshape(-1)
    pvec_np[7, :3 * LPH] = np.asarray(bofa, np.float32).reshape(-1)
    pvec = jnp.asarray(pvec_np)

    # Host-precomputed constant masks / pixel grids, packed per level:
    # rows [l*(H+2), l*(H+2)+H)   : head-broadcast indicator eb (H, H*HW_l)
    # row   l*(H+2)+H             : pixel-center x  (col)
    # row   l*(H+2)+H+1           : pixel-center y  (row)
    Wc = max(H * h_ * w_ for (h_, w_) in ss)
    crows = L * (H + 2)
    consts_np = np.zeros((crows, Wc), np.float32)
    for l, (Hl, Wl) in enumerate(ss):
        HW = Hl * Wl
        b0 = l * (H + 2)
        j = np.arange(H * HW)
        consts_np[b0:b0 + H, :H * HW] = (j[None, :] // HW ==
                                         np.arange(H)[:, None]).astype(np.float32)
        s = j % HW
        consts_np[b0 + H, :H * HW] = (s % Wl).astype(np.float32)
        consts_np[b0 + H + 1, :H * HW] = (s // Wl).astype(np.float32)
    consts = jnp.asarray(consts_np)

    kernel = functools.partial(
        injector_kernel, n_heads=H, n_points=P, spatial_shapes=ss,
        level_start=ls, len_q=Lq, len_in=Lin)

    out2d = pl.pallas_call(
        kernel,
        out_shape=jax.ShapeDtypeStruct((B * Lq, D), query.dtype),
        grid=(B,),
        in_specs=[
            pl.BlockSpec((Lq, D + 2 * L), lambda i: (i, 0)),
            pl.BlockSpec((Lin, D), lambda i: (i, 0)),
            pl.BlockSpec((8, Wmax), lambda i: (0, 0)),
            pl.BlockSpec((crows, Wc), lambda i: (0, 0)),
            pl.BlockSpec((D, D), lambda i: (0, 0)),
            pl.BlockSpec((D, 3 * LPH), lambda i: (0, 0)),
            pl.BlockSpec((D, D), lambda i: (0, 0)),
        ],
        out_specs=pl.BlockSpec((Lq, D), lambda i: (i, 0)),
        compiler_params=pltpu.CompilerParams(
            dimension_semantics=("parallel",)),   # batch elements are independent
    )(qr2d, f2d, pvec, consts, params["wv"].astype(jnp.float32), wofa,
      params["wout"].astype(jnp.float32))
    return out2d.reshape(B, Lq, D)


def injector_reference(query, reference_points, feat, spatial_shapes,
                       level_start_index, params, *, n_heads, n_points):
    """Pure-JAX reference, written directly from the PyTorch module semantics
    (independent of the kernel's restructured math)."""
    f32 = jnp.float32
    hp = jax.lax.Precision.HIGHEST
    B, Lq, D = query.shape
    ss = [(int(h), int(w)) for h, w in np.asarray(spatial_shapes)]
    ls = [int(s) for s in np.asarray(level_start_index)]
    L, H, P = len(ss), n_heads, n_points
    hd = D // H
    eps = 1e-6

    def layernorm(x, w, b):
        mu = jnp.mean(x, axis=-1, keepdims=True)
        var = jnp.mean((x - mu) ** 2, axis=-1, keepdims=True)
        return (x - mu) / jnp.sqrt(var + eps) * w.reshape(-1) + b.reshape(-1)

    q_n = layernorm(query, params["qn_w"], params["qn_b"])
    f_n = layernorm(feat, params["fn_w"], params["fn_b"])

    value = jnp.einsum("bld,de->ble", f_n, params["wv"], precision=hp) \
        + params["bv"].reshape(-1)
    offs = (jnp.einsum("bld,de->ble", q_n, params["woff"], precision=hp)
            + params["boff"].reshape(-1)).reshape(B, Lq, H, L, P, 2)
    attw = (jnp.einsum("bld,de->ble", q_n, params["wa"], precision=hp)
            + params["ba"].reshape(-1)).reshape(B, Lq, H, L * P)
    attw = jax.nn.softmax(attw, axis=-1).reshape(B, Lq, H, L, P)

    out_heads = jnp.zeros((B, Lq, H, hd), f32)
    for l in range(L):
        Hl, Wl = ss[l]
        HW = Hl * Wl
        v_l = value[:, ls[l]:ls[l] + HW, :].reshape(B, HW, H, hd)
        col = (jnp.arange(HW) % Wl).astype(f32)
        row = (jnp.arange(HW) // Wl).astype(f32)
        for p in range(P):
            loc_x = reference_points[:, :, l, 0][:, :, None] + offs[:, :, :, l, p, 0] / Wl
            loc_y = reference_points[:, :, l, 1][:, :, None] + offs[:, :, :, l, p, 1] / Hl
            x_pix = loc_x * Wl - 0.5
            y_pix = loc_y * Hl - 0.5
            wx = jnp.maximum(0.0, 1.0 - jnp.abs(x_pix[..., None] - col))
            wy = jnp.maximum(0.0, 1.0 - jnp.abs(y_pix[..., None] - row))
            w = wx * wy * attw[:, :, :, l, p][..., None]            # (B,Lq,H,HW)
            out_heads = out_heads + jnp.einsum("bqhs,bshc->bqhc", w, v_l,
                                               precision=hp)

    attn = jnp.einsum("bqd,de->bqe", out_heads.reshape(B, Lq, D),
                      params["wout"], precision=hp) + params["bout"].reshape(-1)
    return query + params["gamma"].reshape(-1) * attn


if __name__ == "__main__":
    # Module config (Injector defaults: num_heads=6, n_points=4, n_levels=1).
    dim = 48
    num_heads = 6
    n_points = 4
    n_levels = 1
    # NOTE: the module default init_values=0.0 makes gamma == 0 (output == query);
    # use 1.0 here so the deformable-attention path is actually exercised.
    init_values = 1.0

    B = 2
    q_hw = (4, 4)      # query tokens on a 4x4 grid  -> Lq = 16
    feat_hw = (8, 8)   # single feature level 8x8    -> Lin = 64
    Lq = q_hw[0] * q_hw[1]
    Lin = feat_hw[0] * feat_hw[1]

    key = jax.random.PRNGKey(0)
    keys = iter(jax.random.split(key, 16))

    def rnd(shape, scale=0.1):
        return jax.random.normal(next(keys), shape, dtype=jnp.float32) * scale

    query = rnd((B, Lq, dim), 1.0)
    feat = rnd((B, Lin, dim), 1.0)
    reference_points = jax.random.uniform(
        next(keys), (B, Lq, n_levels, 2), dtype=jnp.float32)
    spatial_shapes = jnp.array([[feat_hw[0], feat_hw[1]]], dtype=jnp.int32)
    level_start_index = jnp.array([0], dtype=jnp.int32)

    HLP = num_heads * n_levels * n_points
    params = dict(
        qn_w=jnp.ones((1, dim), jnp.float32),
        qn_b=jnp.zeros((1, dim), jnp.float32),
        fn_w=jnp.ones((1, dim), jnp.float32),
        fn_b=jnp.zeros((1, dim), jnp.float32),
        wv=rnd((dim, dim)),
        bv=rnd((1, dim), 0.02),
        woff=rnd((dim, HLP * 2), 0.02),
        boff=rnd((1, HLP * 2), 0.5),
        wa=rnd((dim, HLP), 0.02),
        ba=rnd((1, HLP), 0.02),
        wout=rnd((dim, dim)),
        bout=rnd((1, dim), 0.02),
        gamma=init_values * jnp.ones((1, dim), jnp.float32),
    )

    out = injector_forward(query, reference_points, feat, spatial_shapes,
                           level_start_index, params,
                           n_heads=num_heads, n_points=n_points)
    out = jax.block_until_ready(out)

    expected = injector_reference(query, reference_points, feat, spatial_shapes,
                                  level_start_index, params,
                                  n_heads=num_heads, n_points=n_points)
    expected = jax.block_until_ready(expected)

    max_err = float(jnp.max(jnp.abs(out - expected)))
    assert jnp.allclose(out, expected, atol=1e-4, rtol=1e-4), max_err

    print("KERNEL_OK")
</pallas_src>

<mosaic_0001>
module attributes {stable_mosaic.version = 11 : i64} {
  func.func @injector_kernel(%arg0: i32, %arg1: memref<16x50xf32, #tpu.memory_space<vmem>>, %arg2: memref<64x48xf32, #tpu.memory_space<vmem>>, %arg3: memref<8x72xf32, #tpu.memory_space<vmem>>, %arg4: memref<8x384xf32, #tpu.memory_space<vmem>>, %arg5: memref<48x48xf32, #tpu.memory_space<vmem>>, %arg6: memref<48x72xf32, #tpu.memory_space<vmem>>, %arg7: memref<48x48xf32, #tpu.memory_space<vmem>>, %arg8: memref<16x48xf32, #tpu.memory_space<vmem>>) attributes {dimension_semantics = [#tpu.dimension_semantics<parallel>], iteration_bounds = array<i64: 2>, scalar_prefetch = 0 : i64, scratch_operands = 0 : i64, tpu.core_type = #tpu.core_type<tc>, window_params = [{transform_indices = @transform_0, window_bounds = array<i64: 16, 50>}, {transform_indices = @transform_1, window_bounds = array<i64: 64, 48>}, {pipeline_mode = #tpu.pipeline_mode<synchronous>, transform_indices = @transform_2, window_bounds = array<i64: 8, 72>}, {pipeline_mode = #tpu.pipeline_mode<synchronous>, transform_indices = @transform_3, window_bounds = array<i64: 8, 384>}, {pipeline_mode = #tpu.pipeline_mode<synchronous>, transform_indices = @transform_4, window_bounds = array<i64: 48, 48>}, {pipeline_mode = #tpu.pipeline_mode<synchronous>, transform_indices = @transform_5, window_bounds = array<i64: 48, 72>}, {pipeline_mode = #tpu.pipeline_mode<synchronous>, transform_indices = @transform_6, window_bounds = array<i64: 48, 48>}, {transform_indices = @transform_7, window_bounds = array<i64: 16, 48>}]} {
    %c0 = arith.constant 0 : index
    %c0_0 = arith.constant 0 : index
    %0 = vector.load %arg1[%c0, %c0_0] : memref<16x50xf32, #tpu.memory_space<vmem>>, vector<16x50xf32>
    %1 = vector.extract_strided_slice %0 {offsets = [0, 0], sizes = [16, 48], strides = [1, 1]} : vector<16x50xf32> to vector<16x48xf32>
    %2 = vector.extract_strided_slice %0 {offsets = [0, 48], sizes = [16, 2], strides = [1, 1]} : vector<16x50xf32> to vector<16x2xf32>
    %c0_1 = arith.constant 0 : index
    %c0_2 = arith.constant 0 : index
    %3 = vector.load %arg2[%c0_1, %c0_2] : memref<64x48xf32, #tpu.memory_space<vmem>>, vector<64x48xf32>
    %c0_3 = arith.constant 0 : index
    %c0_4 = arith.constant 0 : index
    %4 = vector.load %arg3[%c0_3, %c0_4] : memref<8x72xf32, #tpu.memory_space<vmem>>, vector<1x48xf32>
    %c1 = arith.constant 1 : index
    %c0_5 = arith.constant 0 : index
    %5 = vector.load %arg3[%c1, %c0_5] : memref<8x72xf32, #tpu.memory_space<vmem>>, vector<1x48xf32>
    %c2 = arith.constant 2 : index
    %c0_6 = arith.constant 0 : index
    %6 = vector.load %arg3[%c2, %c0_6] : memref<8x72xf32, #tpu.memory_space<vmem>>, vector<1x48xf32>
    %c3 = arith.constant 3 : index
    %c0_7 = arith.constant 0 : index
    %7 = vector.load %arg3[%c3, %c0_7] : memref<8x72xf32, #tpu.memory_space<vmem>>, vector<1x48xf32>
    %c4 = arith.constant 4 : index
    %c0_8 = arith.constant 0 : index
    %8 = vector.load %arg3[%c4, %c0_8] : memref<8x72xf32, #tpu.memory_space<vmem>>, vector<1x48xf32>
    %c5 = arith.constant 5 : index
    %c0_9 = arith.constant 0 : index
    %9 = vector.load %arg3[%c5, %c0_9] : memref<8x72xf32, #tpu.memory_space<vmem>>, vector<1x48xf32>
    %c6 = arith.constant 6 : index
    %c0_10 = arith.constant 0 : index
    %10 = vector.load %arg3[%c6, %c0_10] : memref<8x72xf32, #tpu.memory_space<vmem>>, vector<1x48xf32>
    %c7 = arith.constant 7 : index
    %c0_11 = arith.constant 0 : index
    %11 = vector.load %arg3[%c7, %c0_11] : memref<8x72xf32, #tpu.memory_space<vmem>>, vector<1x72xf32>
    %cst = arith.constant dense<0.000000e+00> : vector<16xf32>
    %12 = vector.multi_reduction <add>, %1, %cst [1] : vector<16x48xf32> to vector<16xf32>
    %13 = vector.shape_cast %12 : vector<16xf32> to vector<16x1xf32>
    %cst_12 = arith.constant 4.800000e+01 : f32
    %14 = vector.broadcast %cst_12 : f32 to vector<16x1xf32>
    %15 = arith.divf %13, %14 : vector<16x1xf32>
    %16 = vector.broadcast %15 : vector<16x1xf32> to vector<16x48xf32>
    %17 = arith.subf %1, %16 : vector<16x48xf32>
    %18 = arith.mulf %17, %17 : vector<16x48xf32>
    %cst_13 = arith.constant dense<0.000000e+00> : vector<16xf32>
    %19 = vector.multi_reduction <add>, %18, %cst_13 [1] : vector<16x48xf32> to vector<16xf32>
    %20 = vector.shape_cast %19 : vector<16xf32> to vector<16x1xf32>
    %cst_14 = arith.constant 4.800000e+01 : f32
    %21 = vector.broadcast %cst_14 : f32 to vector<16x1xf32>
    %22 = arith.divf %20, %21 : vector<16x1xf32>
    %23 = vector.broadcast %15 : vector<16x1xf32> to vector<16x48xf32>
    %24 = arith.subf %1, %23 : vector<16x48xf32>
    %cst_15 = arith.constant 9.99999997E-7 : f32
    %25 = vector.broadcast %cst_15 : f32 to vector<16x1xf32>
    %26 = arith.addf %22, %25 : vector<16x1xf32>
    %27 = math.rsqrt %26 : vector<16x1xf32>
    %28 = vector.broadcast %27 : vector<16x1xf32> to vector<16x48xf32>
    %29 = arith.mulf %24, %28 : vector<16x48xf32>
    %30 = vector.broadcast %4 : vector<1x48xf32> to vector<16x48xf32>
    %31 = arith.mulf %29, %30 : vector<16x48xf32>
    %32 = vector.broadcast %5 : vector<1x48xf32> to vector<16x48xf32>
    %33 = arith.addf %31, %32 : vector<16x48xf32>
    %cst_16 = arith.constant dense<0.000000e+00> : vector<64xf32>
    %34 = vector.multi_reduction <add>, %3, %cst_16 [1] : vector<64x48xf32> to vector<64xf32>
    %35 = vector.shape_cast %34 : vector<64xf32> to vector<64x1xf32>
    %cst_17 = arith.constant 4.800000e+01 : f32
    %36 = vector.broadcast %cst_17 : f32 to vector<64x1xf32>
    %37 = arith.divf %35, %36 : vector<64x1xf32>
    %38 = vector.broadcast %37 : vector<64x1xf32> to vector<64x48xf32>
    %39 = arith.subf %3, %38 : vector<64x48xf32>
    %40 = arith.mulf %39, %39 : vector<64x48xf32>
    %cst_18 = arith.constant dense<0.000000e+00> : vector<64xf32>
    %41 = vector.multi_reduction <add>, %40, %cst_18 [1] : vector<64x48xf32> to vector<64xf32>
    %42 = vector.shape_cast %41 : vector<64xf32> to vector<64x1xf32>
    %cst_19 = arith.constant 4.800000e+01 : f32
    %43 = vector.broadcast %cst_19 : f32 to vector<64x1xf32>
    %44 = arith.divf %42, %43 : vector<64x1xf32>
    %45 = vector.broadcast %37 : vector<64x1xf32> to vector<64x48xf32>
    %46 = arith.subf %3, %45 : vector<64x48xf32>
    %cst_20 = arith.constant 9.99999997E-7 : f32
    %47 = vector.broadcast %cst_20 : f32 to vector<64x1xf32>
    %48 = arith.addf %44, %47 : vector<64x1xf32>
    %49 = math.rsqrt %48 : vector<64x1xf32>
    %50 = vector.broadcast %49 : vector<64x1xf32> to vector<64x48xf32>
    %51 = arith.mulf %46, %50 : vector<64x48xf32>
    %52 = vector.broadcast %6 : vector<1x48xf32> to vector<64x48xf32>
    %53 = arith.mulf %51, %52 : vector<64x48xf32>
    %54 = vector.broadcast %7 : vector<1x48xf32> to vector<64x48xf32>
    %55 = arith.addf %53, %54 : vector<64x48xf32>
    %c0_21 = arith.constant 0 : index
    %c0_22 = arith.constant 0 : index
    %56 = vector.load %arg5[%c0_21, %c0_22] : memref<48x48xf32, #tpu.memory_space<vmem>>, vector<48x48xf32>
    %cst_23 = arith.constant dense<0.000000e+00> : vector<64x48xf32>
    %57 = tpu.matmul %55, %56, %cst_23 {dimension_numbers = #tpu.dot_dimension_numbers<[1], [0], [0], [1], [0, 0, 1, 1], [], []>} : vector<64x48xf32>, vector<48x48xf32>, vector<64x48xf32> -> vector<64x48xf32>
    %58 = vector.broadcast %8 : vector<1x48xf32> to vector<64x48xf32>
    %59 = arith.addf %57, %58 : vector<64x48xf32>
    %c0_24 = arith.constant 0 : index
    %c0_25 = arith.constant 0 : index
    %60 = vector.load %arg6[%c0_24, %c0_25] : memref<48x72xf32, #tpu.memory_space<vmem>>, vector<48x72xf32>
    %cst_26 = arith.constant dense<0.000000e+00> : vector<16x72xf32>
    %61 = tpu.matmul %33, %60, %cst_26 {dimension_numbers = #tpu.dot_dimension_numbers<[1], [0], [0], [1], [0, 0, 1, 1], [], []>} : vector<16x48xf32>, vector<48x72xf32>, vector<16x72xf32> -> vector<16x72xf32>
    %62 = vector.broadcast %11 : vector<1x72xf32> to vector<16x72xf32>
    %63 = arith.addf %61, %62 : vector<16x72xf32>
    %64 = vector.extract_strided_slice %63 {offsets = [0, 48], sizes = [16, 24], strides = [1, 1]} : vector<16x72xf32> to vector<16x24xf32>
    %65 = vector.extract_strided_slice %64 {offsets = [0, 0], sizes = [16, 6], strides = [1, 1]} : vector<16x24xf32> to vector<16x6xf32>
    %66 = vector.extract_strided_slice %64 {offsets = [0, 6], sizes = [16, 6], strides = [1, 1]} : vector<16x24xf32> to vector<16x6xf32>
    %67 = arith.maximumf %65, %66 : vector<16x6xf32>
    %68 = vector.extract_strided_slice %64 {offsets = [0, 12], sizes = [16, 6], strides = [1, 1]} : vector<16x24xf32> to vector<16x6xf32>
    %69 = arith.maximumf %67, %68 : vector<16x6xf32>
    %70 = vector.extract_strided_slice %64 {offsets = [0, 18], sizes = [16, 6], strides = [1, 1]} : vector<16x24xf32> to vector<16x6xf32>
    %71 = arith.maximumf %69, %70 : vector<16x6xf32>
    %72 = vector.extract_strided_slice %64 {offsets = [0, 0], sizes = [16, 6], strides = [1, 1]} : vector<16x24xf32> to vector<16x6xf32>
    %73 = arith.subf %72, %71 : vector<16x6xf32>
    %74 = math.exp %73 : vector<16x6xf32>
    %75 = vector.extract_strided_slice %64 {offsets = [0, 6], sizes = [16, 6], strides = [1, 1]} : vector<16x24xf32> to vector<16x6xf32>
    %76 = arith.subf %75, %71 : vector<16x6xf32>
    %77 = math.exp %76 : vector<16x6xf32>
    %78 = vector.extract_strided_slice %64 {offsets = [0, 12], sizes = [16, 6], strides = [1, 1]} : vector<16x24xf32> to vector<16x6xf32>
    %79 = arith.subf %78, %71 : vector<16x6xf32>
    %80 = math.exp %79 : vector<16x6xf32>
    %81 = vector.extract_strided_slice %64 {offsets = [0, 18], sizes = [16, 6], strides = [1, 1]} : vector<16x24xf32> to vector<16x6xf32>
    %82 = arith.subf %81, %71 : vector<16x6xf32>
    %83 = math.exp %82 : vector<16x6xf32>
    %84 = arith.addf %74, %77 : vector<16x6xf32>
    %85 = arith.addf %84, %80 : vector<16x6xf32>
    %86 = arith.addf %85, %83 : vector<16x6xf32>
    %c0_27 = arith.constant 0 : index
    %c0_28 = arith.constant 0 : index
    %87 = vector.load %arg4[%c0_27, %c0_28] : memref<8x384xf32, #tpu.memory_space<vmem>>, vector<6x384xf32>
    %c6_29 = arith.constant 6 : index
    %c0_30 = arith.constant 0 : index
    %88 = vector.load %arg4[%c6_29, %c0_30] : memref<8x384xf32, #tpu.memory_space<vmem>>, vector<1x384xf32>
    %c7_31 = arith.constant 7 : index
    %c0_32 = arith.constant 0 : index
    %89 = vector.load %arg4[%c7_31, %c0_32] : memref<8x384xf32, #tpu.memory_space<vmem>>, vector<1x384xf32>
    %90 = vector.extract_strided_slice %2 {offsets = [0, 0], sizes = [16, 1], strides = [1, 1]} : vector<16x2xf32> to vector<16x1xf32>
    %cst_33 = arith.constant 8.000000e+00 : f32
    %91 = vector.broadcast %cst_33 : f32 to vector<16x1xf32>
    %92 = arith.mulf %90, %91 : vector<16x1xf32>
    %cst_34 = arith.constant 5.000000e-01 : f32
    %93 = vector.broadcast %cst_34 : f32 to vector<16x1xf32>
    %94 = arith.subf %92, %93 : vector<16x1xf32>
    %95 = vector.extract_strided_slice %2 {offsets = [0, 1], sizes = [16, 1], strides = [1, 1]} : vector<16x2xf32> to vector<16x1xf32>
    %cst_35 = arith.constant 8.000000e+00 : f32
    %96 = vector.broadcast %cst_35 : f32 to vector<16x1xf32>
    %97 = arith.mulf %95, %96 : vector<16x1xf32>
    %cst_36 = arith.constant 5.000000e-01 : f32
    %98 = vector.broadcast %cst_36 : f32 to vector<16x1xf32>
    %99 = arith.subf %97, %98 : vector<16x1xf32>
    %100 = vector.extract_strided_slice %63 {offsets = [0, 0], sizes = [16, 6], strides = [1, 1]} : vector<16x72xf32> to vector<16x6xf32>
    %101 = vector.extract_strided_slice %63 {offsets = [0, 6], sizes = [16, 6], strides = [1, 1]} : vector<16x72xf32> to vector<16x6xf32>
    %102 = vector.extract_strided_slice %63 {offsets = [0, 12], sizes = [16, 6], strides = [1, 1]} : vector<16x72xf32> to vector<16x6xf32>
    %103 = vector.extract_strided_slice %63 {offsets = [0, 18], sizes = [16, 6], strides = [1, 1]} : vector<16x72xf32> to vector<16x6xf32>
    %104 = vector.extract_strided_slice %63 {offsets = [0, 24], sizes = [16, 6], strides = [1, 1]} : vector<16x72xf32> to vector<16x6xf32>
    %105 = vector.extract_strided_slice %63 {offsets = [0, 30], sizes = [16, 6], strides = [1, 1]} : vector<16x72xf32> to vector<16x6xf32>
    %106 = vector.extract_strided_slice %63 {offsets = [0, 36], sizes = [16, 6], strides = [1, 1]} : vector<16x72xf32> to vector<16x6xf32>
    %107 = vector.extract_strided_slice %63 {offsets = [0, 42], sizes = [16, 6], strides = [1, 1]} : vector<16x72xf32> to vector<16x6xf32>
    %108 = tpu.concatenate %100, %101, %74, %102, %103, %77, %104, %105, %80, %106, %107, %83 in 0 : vector<16x6xf32>, vector<16x6xf32>, vector<16x6xf32>, vector<16x6xf32>, vector<16x6xf32>, vector<16x6xf32>, vector<16x6xf32>, vector<16x6xf32>, vector<16x6xf32>, vector<16x6xf32>, vector<16x6xf32>, vector<16x6xf32> -> vector<192x6xf32>
    %cst_37 = arith.constant dense<0.000000e+00> : vector<192x384xf32>
    %109 = tpu.matmul %108, %87, %cst_37 {dimension_numbers = #tpu.dot_dimension_numbers<[1], [0], [0], [1], [0, 0, 1, 1], [], []>} : vector<192x6xf32>, vector<6x384xf32>, vector<192x384xf32> -> vector<192x384xf32>
    %110 = vector.extract_strided_slice %109 {offsets = [0, 0], sizes = [16, 384], strides = [1, 1]} : vector<192x384xf32> to vector<16x384xf32>
    %111 = vector.extract_strided_slice %109 {offsets = [16, 0], sizes = [16, 384], strides = [1, 1]} : vector<192x384xf32> to vector<16x384xf32>
    %112 = vector.extract_strided_slice %109 {offsets = [32, 0], sizes = [16, 384], strides = [1, 1]} : vector<192x384xf32> to vector<16x384xf32>
    %113 = vector.broadcast %94 : vector<16x1xf32> to vector<16x384xf32>
    %114 = arith.addf %113, %110 : vector<16x384xf32>
    %115 = vector.broadcast %88 : vector<1x384xf32> to vector<16x384xf32>
    %116 = arith.subf %114, %115 : vector<16x384xf32>
    %117 = math.absf %116 : vector<16x384xf32>
    %cst_38 = arith.constant 1.000000e+00 : f32
    %118 = vector.broadcast %cst_38 : f32 to vector<16x384xf32>
    %119 = arith.subf %118, %117 : vector<16x384xf32>
    %cst_39 = arith.constant 0.000000e+00 : f32
    %120 = vector.broadcast %cst_39 : f32 to vector<16x384xf32>
    %121 = arith.maximumf %120, %119 : vector<16x384xf32>
    %122 = vector.broadcast %99 : vector<16x1xf32> to vector<16x384xf32>
    %123 = arith.addf %122, %111 : vector<16x384xf32>
    %124 = vector.broadcast %89 : vector<1x384xf32> to vector<16x384xf32>
    %125 = arith.subf %123, %124 : vector<16x384xf32>
    %126 = math.absf %125 : vector<16x384xf32>
    %cst_40 = arith.constant 1.000000e+00 : f32
    %127 = vector.broadcast %cst_40 : f32 to vector<16x384xf32>
    %128 = arith.subf %127, %126 : vector<16x384xf32>
    %cst_41 = arith.constant 0.000000e+00 : f32
    %129 = vector.broadcast %cst_41 : f32 to vector<16x384xf32>
    %130 = arith.maximumf %129, %128 : vector<16x384xf32>
    %131 = arith.mulf %112, %121 : vector<16x384xf32>
    %132 = arith.mulf %131, %130 : vector<16x384xf32>
    %133 = vector.extract_strided_slice %109 {offsets = [48, 0], sizes = [16, 384], strides = [1, 1]} : vector<192x384xf32> to vector<16x384xf32>
    %134 = vector.extract_strided_slice %109 {offsets = [64, 0], sizes = [16, 384], strides = [1, 1]} : vector<192x384xf32> to vector<16x384xf32>
    %135 = vector.extract_strided_slice %109 {offsets = [80, 0], sizes = [16, 384], strides = [1, 1]} : vector<192x384xf32> to vector<16x384xf32>
    %136 = vector.broadcast %94 : vector<16x1xf32> to vector<16x384xf32>
    %137 = arith.addf %136, %133 : vector<16x384xf32>
    %138 = vector.broadcast %88 : vector<1x384xf32> to vector<16x384xf32>
    %139 = arith.subf %137, %138 : vector<16x384xf32>
    %140 = math.absf %139 : vector<16x384xf32>
    %cst_42 = arith.constant 1.000000e+00 : f32
    %141 = vector.broadcast %cst_42 : f32 to vector<16x384xf32>
    %142 = arith.subf %141, %140 : vector<16x384xf32>
    %cst_43 = arith.constant 0.000000e+00 : f32
    %143 = vector.broadcast %cst_43 : f32 to vector<16x384xf32>
    %144 = arith.maximumf %143, %142 : vector<16x384xf32>
    %145 = vector.broadcast %99 : vector<16x1xf32> to vector<16x384xf32>
    %146 = arith.addf %145, %134 : vector<16x384xf32>
    %147 = vector.broadcast %89 : vector<1x384xf32> to vector<16x384xf32>
    %148 = arith.subf %146, %147 : vector<16x384xf32>
    %149 = math.absf %148 : vector<16x384xf32>
    %cst_44 = arith.constant 1.000000e+00 : f32
    %150 = vector.broadcast %cst_44 : f32 to vector<16x384xf32>
    %151 = arith.subf %150, %149 : vector<16x384xf32>
    %cst_45 = arith.constant 0.000000e+00 : f32
    %152 = vector.broadcast %cst_45 : f32 to vector<16x384xf32>
    %153 = arith.maximumf %152, %151 : vector<16x384xf32>
    %154 = arith.mulf %135, %144 : vector<16x384xf32>
    %155 = arith.mulf %154, %153 : vector<16x384xf32>
    %156 = arith.addf %132, %155 : vector<16x384xf32>
    %157 = vector.extract_strided_slice %109 {offsets = [96, 0], sizes = [16, 384], strides = [1, 1]} : vector<192x384xf32> to vector<16x384xf32>
    %158 = vector.extract_strided_slice %109 {offsets = [112, 0], sizes = [16, 384], strides = [1, 1]} : vector<192x384xf32> to vector<16x384xf32>
    %159 = vector.extract_strided_slice %109 {offsets = [128, 0], sizes = [16, 384], strides = [1, 1]} : vector<192x384xf32> to vector<16x384xf32>
    %160 = vector.broadcast %94 : vector<16x1xf32> to vector<16x384xf32>
    %161 = arith.addf %160, %157 : vector<16x384xf32>
    %162 = vector.broadcast %88 : vector<1x384xf32> to vector<16x384xf32>
    %163 = arith.subf %161, %162 : vector<16x384xf32>
    %164 = math.absf %163 : vector<16x384xf32>
    %cst_46 = arith.constant 1.000000e+00 : f32
    %165 = vector.broadcast %cst_46 : f32 to vector<16x384xf32>
    %166 = arith.subf %165, %164 : vector<16x384xf32>
    %cst_47 = arith.constant 0.000000e+00 : f32
    %167 = vector.broadcast %cst_47 : f32 to vector<16x384xf32>
    %168 = arith.maximumf %167, %166 : vector<16x384xf32>
    %169 = vector.broadcast %99 : vector<16x1xf32> to vector<16x384xf32>
    %170 = arith.addf %169, %158 : vector<16x384xf32>
    %171 = vector.broadcast %89 : vector<1x384xf32> to vector<16x384xf32>
    %172 = arith.subf %170, %171 : vector<16x384xf32>
    %173 = math.absf %172 : vector<16x384xf32>
    %cst_48 = arith.constant 1.000000e+00 : f32
    %174 = vector.broadcast %cst_48 : f32 to vector<16x384xf32>
    %175 = arith.subf %174, %173 : vector<16x384xf32>
    %cst_49 = arith.constant 0.000000e+00 : f32
    %176 = vector.broadcast %cst_49 : f32 to vector<16x384xf32>
    %177 = arith.maximumf %176, %175 : vector<16x384xf32>
    %178 = arith.mulf %159, %168 : vector<16x384xf32>
    %179 = arith.mulf %178, %177 : vector<16x384xf32>
    %180 = arith.addf %156, %179 : vector<16x384xf32>
    %181 = vector.extract_strided_slice %109 {offsets = [144, 0], sizes = [16, 384], strides = [1, 1]} : vector<192x384xf32> to vector<16x384xf32>
    %182 = vector.extract_strided_slice %109 {offsets = [160, 0], sizes = [16, 384], strides = [1, 1]} : vector<192x384xf32> to vector<16x384xf32>
    %183 = vector.extract_strided_slice %109 {offsets = [176, 0], sizes = [16, 384], strides = [1, 1]} : vector<192x384xf32> to vector<16x384xf32>
    %184 = vector.broadcast %94 : vector<16x1xf32> to vector<16x384xf32>
    %185 = arith.addf %184, %181 : vector<16x384xf32>
    %186 = vector.broadcast %88 : vector<1x384xf32> to vector<16x384xf32>
    %187 = arith.subf %185, %186 : vector<16x384xf32>
    %188 = math.absf %187 : vector<16x384xf32>
    %cst_50 = arith.constant 1.000000e+00 : f32
    %189 = vector.broadcast %cst_50 : f32 to vector<16x384xf32>
    %190 = arith.subf %189, %188 : vector<16x384xf32>
    %cst_51 = arith.constant 0.000000e+00 : f32
    %191 = vector.broadcast %cst_51 : f32 to vector<16x384xf32>
    %192 = arith.maximumf %191, %190 : vector<16x384xf32>
    %193 = vector.broadcast %99 : vector<16x1xf32> to vector<16x384xf32>
    %194 = arith.addf %193, %182 : vector<16x384xf32>
    %195 = vector.broadcast %89 : vector<1x384xf32> to vector<16x384xf32>
    %196 = arith.subf %194, %195 : vector<16x384xf32>
    %197 = math.absf %196 : vector<16x384xf32>
    %cst_52 = arith.constant 1.000000e+00 : f32
    %198 = vector.broadcast %cst_52 : f32 to vector<16x384xf32>
    %199 = arith.subf %198, %197 : vector<16x384xf32>
    %cst_53 = arith.constant 0.000000e+00 : f32
    %200 = vector.broadcast %cst_53 : f32 to vector<16x384xf32>
    %201 = arith.maximumf %200, %199 : vector<16x384xf32>
    %202 = arith.mulf %183, %192 : vector<16x384xf32>
    %203 = arith.mulf %202, %201 : vector<16x384xf32>
    %204 = arith.addf %180, %203 : vector<16x384xf32>
    %205 = vector.extract_strided_slice %204 {offsets = [0, 0], sizes = [16, 64], strides = [1, 1]} : vector<16x384xf32> to vector<16x64xf32>
    %206 = vector.extract_strided_slice %59 {offsets = [0, 0], sizes = [64, 8], strides = [1, 1]} : vector<64x48xf32> to vector<64x8xf32>
    %cst_54 = arith.constant dense<0.000000e+00> : vector<16x8xf32>
    %207 = tpu.matmul %205, %206, %cst_54 {dimension_numbers = #tpu.dot_dimension_numbers<[1], [0], [0], [1], [0, 0, 1, 1], [], []>} : vector<16x64xf32>, vector<64x8xf32>, vector<16x8xf32> -> vector<16x8xf32>
    %208 = vector.extract_strided_slice %204 {offsets = [0, 64], sizes = [16, 64], strides = [1, 1]} : vector<16x384xf32> to vector<16x64xf32>
    %209 = vector.extract_strided_slice %59 {offsets = [0, 8], sizes = [64, 8], strides = [1, 1]} : vector<64x48xf32> to vector<64x8xf32>
    %cst_55 = arith.constant dense<0.000000e+00> : vector<16x8xf32>
    %210 = tpu.matmul %208, %209, %cst_55 {dimension_numbers = #tpu.dot_dimension_numbers<[1], [0], [0], [1], [0, 0, 1, 1], [], []>} : vector<16x64xf32>, vector<64x8xf32>, vector<16x8xf32> -> vector<16x8xf32>
    %211 = vector.extract_strided_slice %204 {offsets = [0, 128], sizes = [16, 64], strides = [1, 1]} : vector<16x384xf32> to vector<16x64xf32>
    %212 = vector.extract_strided_slice %59 {offsets = [0, 16], sizes = [64, 8], strides = [1, 1]} : vector<64x48xf32> to vector<64x8xf32>
    %cst_56 = arith.constant dense<0.000000e+00> : vector<16x8xf32>
    %213 = tpu.matmul %211, %212, %cst_56 {dimension_numbers = #tpu.dot_dimension_numbers<[1], [0], [0], [1], [0, 0, 1, 1], [], []>} : vector<16x64xf32>, vector<64x8xf32>, vector<16x8xf32> -> vector<16x8xf32>
    %214 = vector.extract_strided_slice %204 {offsets = [0, 192], sizes = [16, 64], strides = [1, 1]} : vector<16x384xf32> to vector<16x64xf32>
    %215 = vector.extract_strided_slice %59 {offsets = [0, 24], sizes = [64, 8], strides = [1, 1]} : vector<64x48xf32> to vector<64x8xf32>
    %cst_57 = arith.constant dense<0.000000e+00> : vector<16x8xf32>
    %216 = tpu.matmul %214, %215, %cst_57 {dimension_numbers = #tpu.dot_dimension_numbers<[1], [0], [0], [1], [0, 0, 1, 1], [], []>} : vector<16x64xf32>, vector<64x8xf32>, vector<16x8xf32> -> vector<16x8xf32>
    %217 = vector.extract_strided_slice %204 {offsets = [0, 256], sizes = [16, 64], strides = [1, 1]} : vector<16x384xf32> to vector<16x64xf32>
    %218 = vector.extract_strided_slice %59 {offsets = [0, 32], sizes = [64, 8], strides = [1, 1]} : vector<64x48xf32> to vector<64x8xf32>
    %cst_58 = arith.constant dense<0.000000e+00> : vector<16x8xf32>
    %219 = tpu.matmul %217, %218, %cst_58 {dimension_numbers = #tpu.dot_dimension_numbers<[1], [0], [0], [1], [0, 0, 1, 1], [], []>} : vector<16x64xf32>, vector<64x8xf32>, vector<16x8xf32> -> vector<16x8xf32>
    %220 = vector.extract_strided_slice %204 {offsets = [0, 320], sizes = [16, 64], strides = [1, 1]} : vector<16x384xf32> to vector<16x64xf32>
    %221 = vector.extract_strided_slice %59 {offsets = [0, 40], sizes = [64, 8], strides = [1, 1]} : vector<64x48xf32> to vector<64x8xf32>
    %cst_59 = arith.constant dense<0.000000e+00> : vector<16x8xf32>
    %222 = tpu.matmul %220, %221, %cst_59 {dimension_numbers = #tpu.dot_dimension_numbers<[1], [0], [0], [1], [0, 0, 1, 1], [], []>} : vector<16x64xf32>, vector<64x8xf32>, vector<16x8xf32> -> vector<16x8xf32>
    %223 = tpu.reciprocal %86 : vector<16x6xf32> -> vector<16x6xf32>
    %224 = vector.extract_strided_slice %223 {offsets = [0, 0], sizes = [16, 1], strides = [1, 1]} : vector<16x6xf32> to vector<16x1xf32>
    %225 = vector.broadcast %224 : vector<16x1xf32> to vector<16x8xf32>
    %226 = arith.mulf %207, %225 : vector<16x8xf32>
    %227 = vector.extract_strided_slice %223 {offsets = [0, 1], sizes = [16, 1], strides = [1, 1]} : vector<16x6xf32> to vector<16x1xf32>
    %228 = vector.broadcast %227 : vector<16x1xf32> to vector<16x8xf32>
    %229 = arith.mulf %210, %228 : vector<16x8xf32>
    %230 = vector.extract_strided_slice %223 {offsets = [0, 2], sizes = [16, 1], strides = [1, 1]} : vector<16x6xf32> to vector<16x1xf32>
    %231 = vector.broadcast %230 : vector<16x1xf32> to vector<16x8xf32>
    %232 = arith.mulf %213, %231 : vector<16x8xf32>
    %233 = vector.extract_strided_slice %223 {offsets = [0, 3], sizes = [16, 1], strides = [1, 1]} : vector<16x6xf32> to vector<16x1xf32>
    %234 = vector.broadcast %233 : vector<16x1xf32> to vector<16x8xf32>
    %235 = arith.mulf %216, %234 : vector<16x8xf32>
    %236 = vector.extract_strided_slice %223 {offsets = [0, 4], sizes = [16, 1], strides = [1, 1]} : vector<16x6xf32> to vector<16x1xf32>
    %237 = vector.broadcast %236 : vector<16x1xf32> to vector<16x8xf32>
    %238 = arith.mulf %219, %237 : vector<16x8xf32>
    %239 = vector.extract_strided_slice %223 {offsets = [0, 5], sizes = [16, 1], strides = [1, 1]} : vector<16x6xf32> to vector<16x1xf32>
    %240 = vector.broadcast %239 : vector<16x1xf32> to vector<16x8xf32>
    %241 = arith.mulf %222, %240 : vector<16x8xf32>
    %242 = tpu.concatenate %226, %229, %232, %235, %238, %241 in 1 : vector<16x8xf32>, vector<16x8xf32>, vector<16x8xf32>, vector<16x8xf32>, vector<16x8xf32>, vector<16x8xf32> -> vector<16x48xf32>
    %c0_60 = arith.constant 0 : index
    %c0_61 = arith.constant 0 : index
    %243 = vector.load %arg7[%c0_60, %c0_61] : memref<48x48xf32, #tpu.memory_space<vmem>>, vector<48x48xf32>
    %cst_62 = arith.constant dense<0.000000e+00> : vector<16x48xf32>
    %244 = tpu.matmul %242, %243, %cst_62 {dimension_numbers = #tpu.dot_dimension_numbers<[1], [0], [0], [1], [0, 0, 1, 1], [], []>} : vector<16x48xf32>, vector<48x48xf32>, vector<16x48xf32> -> vector<16x48xf32>
    %245 = vector.broadcast %9 : vector<1x48xf32> to vector<16x48xf32>
    %246 = arith.addf %244, %245 : vector<16x48xf32>
    %247 = vector.broadcast %10 : vector<1x48xf32> to vector<16x48xf32>
    %248 = arith.mulf %247, %246 : vector<16x48xf32>
    %249 = arith.addf %1, %248 : vector<16x48xf32>
    %c0_63 = arith.constant 0 : index
    %c0_64 = arith.constant 0 : index
    %250 = vector.load %arg8[%c0_63, %c0_64] : memref<16x48xf32, #tpu.memory_space<vmem>>, vector<16x48xf32>
    tpu.vector_store %arg8[%c0_63, %c0_64], %249 {strides = array<i32>} : memref<16x48xf32, #tpu.memory_space<vmem>>, vector<16x48xf32>,
    return
  }
  func.func @transform_0(%arg0: i32) -> (i32, i32) {
    %c0_i32 = arith.constant 0 : i32
    %c0_i32_0 = arith.constant 0 : i32
    return %arg0, %c0_i32 : i32, i32
  }
  func.func @transform_1(%arg0: i32) -> (i32, i32) {
    %c0_i32 = arith.constant 0 : i32
    %c0_i32_0 = arith.constant 0 : i32
    return %arg0, %c0_i32 : i32, i32
  }
  func.func @transform_2(%arg0: i32) -> (i32, i32) {
    %c0_i32 = arith.constant 0 : i32
    %c0_i32_0 = arith.constant 0 : i32
    %c0_i32_1 = arith.constant 0 : i32
    return %c0_i32, %c0_i32_0 : i32, i32
  }
  func.func @transform_3(%arg0: i32) -> (i32, i32) {
    %c0_i32 = arith.constant 0 : i32
    %c0_i32_0 = arith.constant 0 : i32
    %c0_i32_1 = arith.constant 0 : i32
    return %c0_i32, %c0_i32_0 : i32, i32
  }
  func.func @transform_4(%arg0: i32) -> (i32, i32) {
    %c0_i32 = arith.constant 0 : i32
    %c0_i32_0 = arith.constant 0 : i32
    %c0_i32_1 = arith.constant 0 : i32
    return %c0_i32, %c0_i32_0 : i32, i32
  }
  func.func @transform_5(%arg0: i32) -> (i32, i32) {
    %c0_i32 = arith.constant 0 : i32
    %c0_i32_0 = arith.constant 0 : i32
    %c0_i32_1 = arith.constant 0 : i32
    return %c0_i32, %c0_i32_0 : i32, i32
  }
  func.func @transform_6(%arg0: i32) -> (i32, i32) {
    %c0_i32 = arith.constant 0 : i32
    %c0_i32_0 = arith.constant 0 : i32
    %c0_i32_1 = arith.constant 0 : i32
    return %c0_i32, %c0_i32_0 : i32, i32
  }
  func.func @transform_7(%arg0: i32) -> (i32, i32) {
    %c0_i32 = arith.constant 0 : i32
    %c0_i32_0 = arith.constant 0 : i32
    return %arg0, %c0_i32 : i32, i32
  }
}

</mosaic_0001>

<bundles_post_ra>
// kernel: tpu_custom_call.1
= control target key start
LH: loop header
LB: loop body
LE: loop exit
PB: predicated region body
PF: predicated region fallthrough
CT: control target
= control target key end

     0   :  { %12 = vsyncpa [#allocation3], 0  ;;  %s4571_s0 = inlined_call_operand.vmem [shape: f32[32,50], index: 0, kind: input, shape index: {}]   ;;  %s4572_s1 = inlined_call_operand.vmem [shape: f32[128,48], index: 1, kind: input, shape index: {}]   ;;  %s4573_s2 = inlined_call_operand.hbm [shape: f32[8,72], index: 2, kind: input, shape index: {}]   ;;  %s4574_s3 = inlined_call_operand.hbm [shape: f32[8,384], index: 3, kind: input, shape index: {}]   ;;  %s4575_s4 = inlined_call_operand.vmem [shape: f32[48,48], index: 4, kind: input, shape index: {}]   ;;  %s4576_s5 = inlined_call_operand.vmem [shape: f32[48,72], index: 5, kind: input, shape index: {}]   ;;  %s4577_s6 = inlined_call_operand.vmem [shape: f32[48,48], index: 6, kind: input, shape index: {}]   ;;  %s4578_s7 = inlined_call_operand.hbm [shape: f32[32,48], index: 7, kind: output, shape index: {}]  }
   0x1   :  { %13 = vsyncpa [#allocation6], 0 }
   0x2   :  { %14 = vsyncpa [#allocation4], 0 }
   0x3   :  { %16 = vsyncpa [#allocation4 + $0x1], 0  ;;  %s3657_s24 = smov 0   ;;  %s3659_s25 = smov 0  }
   0x4   :  { %s3661_s26 = smov 0   ;;  %s3663_s27 = smov 0  }
   0x5 LB: > { %s3678_s28 = sadd.s32 4294967295, %s3580_s27   ;;  %s2649_s29 = sadd.s32 4294967294, %s3580_s27   ;;  %s3580_s27 = sphi %s3663_s27, %s4596_s27   ;;  %s3576_s26 = sphi %s3661_s26, %s4595_s26   ;;  %s3572_s25 = sphi %s3659_s25, %s4594_s25   ;;  %s3568_s24 = sphi %s3657_s24, %s4593_s24  }
   0x6   : > { %s3682_s30 = sadd.s32 1, %s3580_s27   ;;  %s186_s8 = sadd.s32 1, %s3576_s26 }
   0x7   : > { %s183_s9 = ssub.s32 %s3580_s27, %s3682_s30  ;;  %p196_p0 = scmp.ne.s32.totalorder %s3576_s26, %s3572_s25 }
   0x8   : > { %p184_p1 = scmp.eq.s32.totalorder %s183_s9, 0  ;;  %p197_p2 = scmp.eq.s32.totalorder %s3678_s28, 1 }
   0x9   : > { %p202_p3 = scmp.ne.s32.totalorder %s3572_s25, %s3568_s24  ;;  %p203_p4 = scmp.eq.s32.totalorder %s2649_s29, 1 }
   0xa   : > { %s3693_s10 = scalar_select %p184_p1, %s3576_s26, %s186_s8  }
   0xb   : > { %p3695_p5 = por %p197_p2, %p196_p0  ;;  %p3699_p6 = por %p203_p4, %p202_p3 }
   0xc   : > { %p2650_p7 = scmp.ge.s32.totalorder %s3580_s27, 1  ;;  %p210_p8 = scmp.lt.s32.totalorder %s3580_s27, 3 }
   0xd   : > { %s4582_s11 = scalar_select %p3695_p5, 1, 0 }
   0xe   : > { %s4583_s12 = scalar_select %p3699_p6, 1, 0 }
   0xf   : > { %p4579_p9 = scmp.eq.s32.totalorder %s3678_s28, 0  ;;  %p3706_p10 = pnand %p2650_p7, %p210_p8 }
  0x10   : > { %s3582_s14 = smov [#allocation2]   ;;  %s3583_s16 = smov [#allocation5]  }
  0x11   : > { %s4584_s13 = scalar_select %p3706_p10, 1, 0 }
  0x12   : > { %s223_s15 = sshll.u32 %s3582_s14, 4  ;;  %p3216_p11 = pneg %p3706_p10  ;;  %s224_s15 = int_to_ptr.vmem [resolvable:$true] %s223_s15 }
  0x13   : > { %s234_s17 = sshll.u32 %s3583_s16, 4  ;;  %s3454_s21 = scalar_lea.hbm %s4573_s2, 128  ;;  %s3718_s17 = int_to_ptr.vmem [resolvable:$true] %s234_s17 }
  0x14   : > { %p3714_p12 = pnand %p4579_p9, %p3216_p11  ;;  %p3455_p13 = scmp.ne.s32.totalorder %s4573_s2, %s3454_s21 }
  0x15   : > { %p3461_p3 = scmp.lt.u32.totalorder %s3454_s21, %s4573_s2 }
  0x16   : > { %p3456_p0 = pneg %p3714_p12 }
  0x18   : > { %p3457_p1 = pnand %p3456_p0, %p3455_p13 }
  0x1a   : > { %p3458_p2 = pneg %p3457_p1 }
  0x1c   : > { %p3463_p4 = pnand %p3461_p3, %p3458_p2 }
  0x1e   : > { %3466 = shalt.err (!%p3463_p4)
}
  0x1f   : > { %s3467_s9 = scalar_lea.vmem %s224_s15, 128  ;;  %p3475_p9 = scmp.lt.s32.totalorder %s224_s15, %s224_s15 }
  0x20   : > { %p3468_p7 = scmp.ne.s32.totalorder %s224_s15, %s3467_s9  ;;  %p3476_p6 = scmp.lt.s32.totalorder %s3467_s9, %s3467_s9 }
  0x22   : > { %p3470_p8 = pnand %p3468_p7, %p3456_p0  ;;  %p3477_p5 = por %p3476_p6, %p3475_p9 }
  0x24   : > { %p3471_p11 = pneg %p3470_p8 }
  0x26   : > { %p3478_p10 = pnand %p3477_p5, %p3471_p11 }
  0x28   : > { %3481 = shalt.err (!%p3478_p10)
}
  0x29   : > { %3219 = dma.hbm_to_vmem [thread:$0]  (!%p3714_p12), %s4573_s2, 128, %s224_s15, [#allocation3]  }
  0x2a   : > { %s3482_s21 = scalar_lea.hbm %s4574_s3, 384 }
  0x2b   : > { %p3483_p13 = scmp.ne.s32.totalorder %s4574_s3, %s3482_s21  ;;  %p3489_p9 = scmp.lt.u32.totalorder %s3482_s21, %s4574_s3 }
  0x2d   : > { %p3485_p6 = pnand %p3483_p13, %p3456_p0 }
  0x2f   : > { %p3486_p5 = pneg %p3485_p6 }
  0x31   : > { %p3491_p10 = pnand %p3489_p9, %p3486_p5 }
  0x33   : > { %3494 = shalt.err (!%p3491_p10)
}
  0x34   : > { %s3495_s15 = scalar_lea.vmem %s3718_s17, 384  ;;  %p3503_p4 = scmp.lt.s32.totalorder %s3718_s17, %s3718_s17 }
  0x35   : > { %p3496_p1 = scmp.ne.s32.totalorder %s3718_s17, %s3495_s15  ;;  %p3504_p7 = scmp.lt.s32.totalorder %s3495_s15, %s3495_s15 }
  0x37   : > { %p3498_p2 = pnand %p3496_p1, %p3456_p0  ;;  %p3505_p8 = por %p3504_p7, %p3503_p4 }
  0x39   : > { %p3499_p3 = pneg %p3498_p2 }
  0x3b   : > { %p3506_p11 = pnand %p3505_p8, %p3499_p3 }
  0x3d   : > { %3509 = shalt.err (!%p3506_p11)
}
  0x3e   : > { %3222 = dma.hbm_to_vmem [thread:$0]  (!%p3714_p12), %s4574_s3, 384, %s3718_s17, [#allocation6]  }
  0x3f   : > { %p4586_p13 = scmp.ne.s32.totalorder %s4584_s13, 0 }
  0x40   : > { %p4587_p6 = scmp.eq.s32.totalorder (!%p4586_p13), %s3678_s28, 0 }
  0x41   : > { %274 = sbr.rel (%p4586_p13) target bundleno = 2016 (0x7e0), region = 48 }
  0x48   : > { %3555 = dma.done.wait (%p4587_p6), [#allocation3], 128   ;;  %p4588_p0 = pmov %p4587_p6 }
  0x4a   : > { %3557 = vsyncadd (%p4588_p0), [#allocation3], 4294967168  ;;  %p4589_p5 = pmov %p4588_p0 }
  0x4b   : > { %p4590_p9 = pmov %p4588_p0 }
  0x4c   : > { %3559 = dma.done.wait (%p4589_p5), [#allocation6], 384  }
  0x4d   : > { %3561 = vsyncadd (%p4590_p9), [#allocation6], 4294966912  ;;  %s2658_s18 = sshll.u32 %s3678_s28, 1  ;;  %vm346_vm0 = vcmask 392192   ;;  %s2660_s20 = sshll.u32 %s3678_s28, 3  ;;  %v653_v16 = vld [vmem:[%s4576_s5] sm:$0xff] }
  0x4e   : > { %p316_p10 = scmp.lt.s32.totalorder %s2658_s18, 3  ;;  %p322_p12 = scmp.lt.s32.totalorder %s2660_s20, 15  ;;  %v654_v17 = vld [vmem:[%s4576_s5 + $0x8] sm:$0xff]  ;;  %v655_v18 = vld [vmem:[%s4576_s5 + $0x10] sm:$0xff]  ;;  %v656_v20 = vld [vmem:[%s4576_s5 + $0x18] sm:$0xff]  ;;  %vm938_vm1 = vcmask 1045504  }
  0x4f   : > { %v3086_v19 = vpack.c.bf16 %v654_v17, %v653_v16  ;;  %v3090_v21 = vpack.c.bf16 %v656_v20, %v655_v18  ;;  %v657_v22 = vld [vmem:[%s4576_s5 + $0x20] sm:$0xff]  ;;  %v658_v23 = vld [vmem:[%s4576_s5 + $0x28] sm:$0xff]  ;;  %vm889_vm2 = vcmask 48128   ;;  %s3586_s8 = smov 116   ;;  %s3587_s15 = smov 110   ;;  %vm1698_vm3 = vcmask 523264  }
  0x50   : > { %s4598_s18 = smov (!%p316_p10, %s2658_s18), 3  ;;  %s4600_s20 = smov (!%p322_p12, %s2660_s20), 15  ;;  %v3094_v24 = vpack.c.bf16 %v658_v23, %v657_v22  ;;  %v2662_v51 = vld [vmem:[#allocation2] ss:$0 sm:$0xff]  ;;  %v2663_v53 = vld [vmem:[#allocation2 + $0x1] ss:$0 sm:$0xff] }
  0x51   : > { %s2659_s17 = sshll.u32 %s4598_s18, 3  ;;  %s2661_s21 = sshll.u32 %s4600_s20, 3  ;;  %3087 = vmatprep.subr.bf16.mxu1 %v3086_v19  ;;  %vm2423_vm4 = vcmask 64512   ;;  %vm2426_vm5 = vcmask 130048   ;;  %vm2429_vm6 = vcmask 195584   ;;  %vm2432_vm7 = vcmask 261120  }
  0x52   : > { %s3781_s19 = scalar_lea.vmem %s4571_s0, %s2659_s17  ;;  %s3797_s29 = scalar_lea.vmem %s4572_s1, %s2661_s21  ;;  %3089 = vmatpush3.bf16.msra.mxu1 %v3086_v19  ;;  %vm2435_vm8 = vcmask 326656  }
  0x53   : > { %v3784_v0 = vld [vmem:[%s3781_s19] sm:$0xff]  ;;  %v3787_v1 = vld [vmem:[%s3781_s19 + $0x8] sm:$0xff]  ;;  %3091 = vmatprep.subr.bf16.mxu1 %v3090_v21  ;;  %v3824_v25 = vld [vmem:[%s3797_s29 + $0x10] sm:$0xff]  ;;  %s3588_s18 = smov 18   ;;  %s3589_s17 = smov 6  }
  0x54   : > { %v347_v2 = vsel %vm346_vm0, %v3784_v0, 0.0  ;;  %v350_v3 = vsel %vm346_vm0, %v3787_v1, 0.0  ;;  %v330_v4 = vld [vmem:[%s3797_s29] sm:$0xff]  ;;  %v3827_v26 = vld [vmem:[%s3797_s29 + $0x18] sm:$0xff]  ;;  %v392_v28 = vsel %vm346_vm0, %v3824_v25, 0.0  ;;  %v3832_v29 = vld [vmem:[%s3797_s29 + $0x8] sm:$0xff] }
  0x55   : > { %348 = vadd.xlane.f32.xlu0 %v347_v2  ;;  %v386_v5 = vsel %vm346_vm0, %v330_v4, 0.0  ;;  %v395_v30 = vsel %vm346_vm0, %v3827_v26, 0.0  ;;  %v389_v32 = vsel %vm346_vm0, %v3832_v29, 0.0  ;;  %v3839_v33 = vld [vmem:[%s3797_s29 + $0x20] sm:$0xff]  ;;  %v3844_v36 = vld [vmem:[%s3797_s29 + $0x30] sm:$0xff]  ;;  %v3850_v40 = vld [vmem:[%s3797_s29 + $0x28] sm:$0xff] }
  0x56   : > { %3093 = vmatpush3.bf16.msra.mxu1 %v3090_v21  ;;  %v398_v34 = vsel %vm346_vm0, %v3839_v33, 0.0  ;;  %v404_v37 = vsel %vm346_vm0, %v3844_v36, 0.0  ;;  %v3853_v41 = vld [vmem:[%s3797_s29 + $0x38] sm:$0xff]  ;;  %v401_v42 = vsel %vm346_vm0, %v3850_v40, 0.0  ;;  %s3585_s29 = smov 122   ;;  %s3590_s13 = smov 12  }
  0x57   : > { %3095 = vmatprep.subr.bf16.mxu1 %v3094_v24  ;;  %v407_v43 = vsel %vm346_vm0, %v3853_v41, 0.0  ;;  %s3592_s16 = smov 80   ;;  %s3593_s20 = smov 74  }
  0x58   : > { %s3594_s21 = smov 104   ;;  %s3595_s22 = smov 98  }
  0x59   : > { %351 = vadd.xlane.f32.xlu0 %v350_v3  ;;  %s3596_s23 = smov 68   ;;  %s3597_s9 = smov 92  }
  0x5a   : > { %3097 = vmatpush3.bf16.msra.mxu1 %v3094_v24  ;;  %s3598_s14 = smov 86   ;;  %p4591_p2 = scmp.ne.s32.totalorder %s4582_s11, 0 }
  0x5d   : > { %387 = vadd.xlane.f32.xlu0 %v386_v5 }
  0x61   : > { %393 = vadd.xlane.f32.xlu0 %v392_v28 }
  0x65   : > { %396 = vadd.xlane.f32.xlu0 %v395_v30 }
  0x69   : > { %399 = vadd.xlane.f32.xlu0 %v398_v34  ;;  %v514_v34 = vld [vmem:[%s4575_s4] sm:$0xff] }
  0x6d   : > { %405 = vadd.xlane.f32.xlu0 %v404_v37 }
  0xe2   : > { %v349_v6 = vpop.xlane.xlu0 %348 }
  0xe3   : > { %v354_v7 = vmul.f32 0.020833334, %v349_v6  ;;  %v3865_v6 = vld [vmem:[#allocation2 + $0x2] ss:$0 sm:$0xff] }
  0xe5   : > { %v356_v8 = vsub.f32 %v3784_v0, %v354_v7 }
  0xe6   : > { %v352_v9 = vpop.xlane.xlu0 %351 }
  0xe7   : > { %v355_v10 = vmul.f32 0.020833334, %v352_v9  ;;  %v358_v11 = vmul.f32 %v356_v8, %v356_v8 }
  0xe9   : > { %v357_v12 = vsub.f32 %v3787_v1, %v355_v10  ;;  %v360_v13 = vsel %vm346_vm0, %v358_v11, 0.0  ;;  %v845_v11 = vld [vmem:[#allocation5 + $0x8] sm:$0x3f] }
  0xea   : > { %361 = vadd.xlane.f32.xlu1 %v360_v13  ;;  %v388_v27 = vpop.xlane.xlu0 %387  ;;  %2680 = vmatprep.subr.msk.mxu1 %vm938_vm1, %v845_v11  ;;  %v3584_v13 = vmov 0.0  }
  0xeb   : > { %v359_v14 = vmul.f32 %v357_v12, %v357_v12  ;;  %v410_v31 = vmul.f32 0.020833334, %v388_v27 }
  0xed   : > { %v363_v15 = vsel %vm346_vm0, %v359_v14, 0.0  ;;  %v418_v35 = vsub.f32 %v330_v4, %v410_v31  ;;  %v2675_v14 = vld [vmem:[#allocation2 + $0x7] ss:$0 sm:$0xff] }
  0xee   : > { %364 = vadd.xlane.f32.xlu1 %v363_v15  ;;  %v394_v60 = vpop.xlane.xlu0 %393 }
  0xef   : > { %v426_v38 = vmul.f32 %v418_v35, %v418_v35  ;;  %v412_v19 = vmul.f32 0.020833334, %v394_v60 }
  0xf1   : > { %v434_v39 = vsel %vm346_vm0, %v426_v38, 0.0  ;;  %v3898_v20 = vsub.f32 %v3824_v25, %v412_v19  ;;  %v517_v38 = vld [vmem:[%s4575_s4 + $0x18] sm:$0xff] }
  0xf2   : > { %390 = vadd.xlane.f32.xlu1 %v389_v32  ;;  %435 = vadd.xlane.f32.xlu0 %v434_v39  ;;  %v397_v61 = vpop.xlane.xlu0 %396 }
  0xf3   : > { %v413_v21 = vmul.f32 0.020833334, %v397_v61  ;;  %v428_v23 = vmul.f32 %v3898_v20, %v3898_v20 }
  0xf5   : > { %v3901_v22 = vsub.f32 %v3827_v26, %v413_v21  ;;  %v440_v27 = vsel %vm346_vm0, %v428_v23, 0.0 }
  0xf6   : > { %402 = vadd.xlane.f32.xlu1 %v401_v42  ;;  %v3861_v62 = vpop.xlane.xlu0 %399  ;;  %v518_v42 = vld [vmem:[%s4575_s4 + $0x20] sm:$0xff] }
  0xf7   : > { %v429_v28 = vmul.f32 %v3901_v22, %v3901_v22 }
  0xf9   : > { %v443_v31 = vsel %vm346_vm0, %v429_v28, 0.0 }
  0xfa   : > { %408 = vadd.xlane.f32.xlu1 %v407_v43  ;;  %v3863_v63 = vpop.xlane.xlu0 %405  ;;  %v519_v43 = vld [vmem:[%s4575_s4 + $0x28] sm:$0xff] }
 0x177   : > { %v362_v44 = vpop.xlane.xlu1 %361 }
 0x178   : > { %v366_v45 = vmul.f32 0.020833334, %v362_v44  ;;  %v3082_v44 = vpack.c.bf16 %v519_v43, %v518_v42 }
 0x17a   : > { %v368_v46 = vadd.f32 1e-06, %v366_v45 }
 0x17b   : > { %v365_v47 = vpop.xlane.xlu1 %364 }
 0x17c   : > { %3412 = vrsqrt.f32 %v368_v46  ;;  %v367_v48 = vmul.f32 0.020833334, %v365_v47 }
 0x17e   : > { %v369_v49 = vadd.f32 1e-06, %v367_v48 }
 0x17f   : > { %v436_v2 = vpop.xlane.xlu0 %435  ;;  %v391_v24 = vpop.xlane.xlu1 %390 }
 0x180   : > { %3414 = vrsqrt.f32 %v369_v49  ;;  %v458_v3 = vmul.f32 0.020833334, %v436_v2  ;;  %v411_v30 = vmul.f32 0.020833334, %v391_v24 }
 0x182   : > { %v466_v4 = vadd.f32 1e-06, %v458_v3  ;;  %v3910_v25 = vsub.f32 %v3832_v29, %v411_v30  ;;  %v516_v29 = vld [vmem:[%s4575_s4 + $0x10] sm:$0xff]  ;;  %v3591_v3 = vmov 48  }
 0x183   : > { %v3078_v39 = vpack.c.bf16 %v517_v38, %v516_v29  ;;  %v403_v45 = vpop.xlane.xlu1 %402  ;;  %3299 = vset.pattern.permute.xlu1 %v3591_v3  ;;  %3298 = vset.pattern.permute.xlu0 %v3591_v3 }
 0x184   : > { %3416 = vrsqrt.f32 %v466_v4  ;;  %v427_v26 = vmul.f32 %v3910_v25, %v3910_v25  ;;  %v415_v60 = vmul.f32 0.020833334, %v403_v45 }
 0x186   : > { %v3413_v50 = vpop.eup %3412  ;;  %v437_v32 = vsel %vm346_vm0, %v427_v26, 0.0  ;;  %v3967_v2 = vsub.f32 %v3850_v40, %v415_v60 }
 0x187   : > { %v372_v52 = vmul.f32 %v3413_v50, %v356_v8  ;;  %v3867_v8 = vld [vmem:[#allocation2 + $0x3] ss:$0 sm:$0xff]  ;;  %v3933_v46 = vpop.xlane.xlu1 %408 }
 0x189   : > { %v378_v54 = vmul.f32 %v2662_v51, %v372_v52 }
 0x18a   : > { %v3415_v55 = vpop.eup %3414 }
 0x18b   : > { %v373_v56 = vmul.f32 %v3415_v55, %v357_v12  ;;  %v384_v57 = vadd.f32 %v2663_v53, %v378_v54  ;;  %v844_v12 = vld [vmem:[#allocation5] sm:$0x3f] }
 0x18d   : > { %v379_v58 = vmul.f32 %v2662_v51, %v373_v56  ;;  %2904 = vmatprep.mubr.msk.f32.mxu1 %vm346_vm0, %v384_v57 }
 0x18e   : > { %v3417_v5 = vpop.eup %3416 }
 0x18f   : > { %v385_v59 = vadd.f32 %v2663_v53, %v379_v58  ;;  %v482_v7 = vmul.f32 %v3417_v5, %v418_v35  ;;  %v515_v35 = vld [vmem:[%s4575_s4 + $0x8] sm:$0xff]  ;;  %v431_v5 = vmul.f32 %v3967_v2, %v3967_v2 }
 0x190   : > { %v3074_v37 = vpack.c.bf16 %v515_v35, %v514_v34 }
 0x191   : > { %2905 = vmatmul.mubr.msk.f32.vlgmr.msra.gmra.mrb[0].mxu1 %vm346_vm0, %v385_v59  ;;  %v494_v9 = vmul.f32 %v3865_v6, %v482_v7  ;;  %v414_v59 = vmul.f32 0.020833334, %v3861_v62 }
 0x192   : > { %2681 = vmatpush1.msk.msra.mxu1 %vm938_vm1, %v844_v12  ;;  %1012 = vmatprep.mubr.f32.mxu1 %v3584_v13 }
 0x193   : > { %v506_v10 = vadd.f32 %v3867_v8, %v494_v9  ;;  %3075 = vmatprep.subr.bf16.mxu0 %v3074_v37  ;;  %v3964_v61 = vsub.f32 %v3839_v33, %v414_v59  ;;  %v449_v33 = vsel %vm346_vm0, %v431_v5, 0.0 }
 0x194   : > { %3077 = vmatpush3.bf16.msra.mxu0 %v3074_v37 }
 0x195   : > { %2880 = vmatprep.mubr.msk.f32.mxu0 %vm346_vm0, %v506_v10  ;;  %3079 = vmatprep.subr.bf16.mxu0 %v3078_v39  ;;  %v430_v4 = vmul.f32 %v3964_v61, %v3964_v61 }
 0x197   : > { %v446_v62 = vsel %vm346_vm0, %v430_v4, 0.0 }
 0x198   : > { %3081 = vmatpush3.bf16.msra.mxu0 %v3078_v39 }
 0x199   : > { %3083 = vmatprep.subr.bf16.mxu0 %v3082_v44 }
 0x19c   : > { %3085 = vmatpush3.bf16.msra.mxu0 %v3082_v44 }
 0x264   : > { %v2906_v15 = vpop.f32.mrb[0].mxu1 }
 0x265   : > { %v3875_v16 = vadd.f32 %v2906_v15, %v2675_v14  ;;  %v735_v17 = vpop.f32.mrb[1].mxu1 }
 0x266   : > { %v3877_v18 = vadd.f32 %v2675_v14, %v735_v17 }
 0x267   : > { %748 = vrot.lane.b32.xlu1 %v3875_v16, %s3585_s29  ;;  %756 = vrot.lane.b32.xlu0 %v3875_v16, %s3586_s8 }
 0x268   : > { %2682 = vmatmul.mubr.msk.f32.vlgmr.msra.gmra.mrb[2].mxu1 %vm889_vm2, %v3877_v18 }
 0x269   : > { %1018 = vmatprep.mubr.f32.mxu1 %v3584_v13 }
 0x26b   : > { %764 = vrot.lane.b32.xlu1 %v3875_v16, %s3587_s15  ;;  %746 = vrot.lane.b32.xlu0 %v3877_v18, %s3585_s29 }
 0x26c   : > { %2683 = vmatmul.mubr.msk.f32.gmra.mrb[4].mxu1 %vm889_vm2, %v3875_v16 }
 0x26d   : > { %1024 = vmatprep.mubr.f32.mxu1 %v3584_v13 }
 0x26f   : > { %754 = vrot.lane.b32.xlu1 %v3877_v18, %s3586_s8 }
 0x273   : > { %762 = vrot.lane.b32.xlu1 %v3877_v18, %s3587_s15 }
 0x28a   : > { %441 = vadd.xlane.f32.xlu0 %v440_v27 }
 0x28e   : > { %444 = vadd.xlane.f32.xlu0 %v443_v31  ;;  %v416_v31 = vmul.f32 0.020833334, %v3863_v63  ;;  %v417_v63 = vmul.f32 0.020833334, %v3933_v46 }
 0x290   : > { %v3989_v35 = vsub.f32 %v3844_v36, %v416_v31  ;;  %v4007_v44 = vsub.f32 %v3853_v41, %v417_v63 }
 0x292   : > { %v432_v42 = vmul.f32 %v3989_v35, %v3989_v35 }
 0x297   : > { %438 = vadd.xlane.f32.xlu1 %v437_v32 }
 0x2d9   : > { %v3935_v47 = vpop.permute.xlu1 %748  ;;  %v3937_v48 = vpop.permute.xlu0 %756 }
 0x2da   : > { %v753_v49 = vmax.f32 %v3875_v16, %v3935_v47 }
 0x2dc   : > { %v761_v50 = vmax.f32 %v753_v49, %v3937_v48 }
 0x2dd   : > { %v3942_v51 = vpop.permute.xlu1 %764  ;;  %v3944_v52 = vpop.permute.xlu0 %746 }
 0x2de   : > { %v769_v53 = vmax.f32 %v761_v50, %v3942_v51  ;;  %2684 = vmatmul.mubr.msk.f32.gmra.mrb[6].mxu1 %vm889_vm2, %v3944_v52  ;;  %v752_v55 = vmax.f32 %v3877_v18, %v3944_v52 }
 0x2df   : > { %1030 = vmatprep.mubr.f32.mxu1 %v3584_v13 }
 0x2e0   : > { %804 = vrot.lane.b32.xlu0 %v769_v53, %s3588_s18  ;;  %780 = vrot.lane.b32.xlu1 %v769_v53, %s3589_s17  ;;  %v771_v40 = vsub.f32 %v3875_v16, %v769_v53 }
 0x2e1   : > { %v3951_v54 = vpop.permute.xlu1 %754 }
 0x2e2   : > { %2685 = vmatmul.mubr.msk.f32.gmra.mrb[8].mxu1 %vm889_vm2, %v3935_v47  ;;  %v760_v56 = vmax.f32 %v752_v55, %v3951_v54  ;;  %v774_v7 = vmul.f32 1.442695, %v771_v40 }
 0x2e3   : > { %1036 = vmatprep.mubr.f32.mxu1 %v3584_v13 }
 0x2e4   : > { %792 = vrot.lane.b32.xlu1 %v769_v53, %s3590_s13  ;;  %3418 = vpow2.f32 %v774_v7  ;;  %v433_v53 = vmul.f32 %v4007_v44, %v4007_v44 }
 0x2e5   : > { %v3959_v57 = vpop.permute.xlu1 %762 }
 0x2e6   : > { %v768_v58 = vmax.f32 %v760_v56, %v3959_v57  ;;  %v455_v55 = vsel %vm346_vm0, %v433_v53, 0.0 }
 0x2e8   : > { %778 = vrot.lane.b32.xlu0 %v768_v58, %s3589_s17  ;;  %v770_v9 = vsub.f32 %v3877_v18, %v768_v58  ;;  %s3601_s17 = smov 120  }
 0x2ea   : > { %v772_v10 = vmul.f32 1.442695, %v770_v9 }
 0x2ec   : > { %3420 = vpow2.f32 %v772_v10  ;;  %v846_v10 = vld [vmem:[#allocation5 + $0x10] sm:$0x3f] }
 0x2ed   : > { %2907 = vmatprep.subr.msk.mxu0 %vm938_vm1, %v846_v10 }
 0x2ee   : > { %v3979_v12 = vpop.eup %3418 }
 0x2f6   : > { %v3983_v19 = vpop.eup %3420 }
 0x307   : > { %447 = vadd.xlane.f32.xlu0 %v446_v62 }
 0x308   : > { %450 = vadd.xlane.f32.xlu1 %v449_v33 }
 0x317   : > { %v442_v11 = vpop.xlane.xlu0 %441 }
 0x318   : > { %v460_v14 = vmul.f32 0.020833334, %v442_v11 }
 0x319   : > { %790 = vrot.lane.b32.xlu1 %v768_v58, %s3590_s13  ;;  %s3602_s13 = smov 112  }
 0x31a   : > { %v468_v21 = vadd.f32 1e-06, %v460_v14 }
 0x31b   : > { %v445_v15 = vpop.xlane.xlu0 %444 }
 0x31c   : > { %v461_v17 = vmul.f32 0.020833334, %v445_v15  ;;  %3422 = vrsqrt.f32 %v468_v21 }
 0x31d   : > { %859 = vrot.lane.b32.xlu1 %v3979_v12, %s3592_s16  ;;  %802 = vrot.lane.b32.xlu0 %v768_v58, %s3588_s18  ;;  %s3599_s18 = smov 62  }
 0x31e   : > { %v469_v23 = vadd.f32 1e-06, %v461_v17  ;;  %v852_v17 = vmul.f32 8.0, %v3787_v1 }
 0x320   : > { %3424 = vrsqrt.f32 %v469_v23  ;;  %v2679_v23 = vadd.f32 -0.5, %v852_v17 }
 0x321   : > { %857 = vrot.lane.b32.xlu1 %v3983_v19, %s3592_s16  ;;  %s3603_s16 = smov 64  }
 0x324   : > { %v439_v24 = vpop.xlane.xlu1 %438 }
 0x325   : > { %v459_v27 = vmul.f32 0.020833334, %v439_v24  ;;  %v851_v24 = vmul.f32 8.0, %v3784_v0 }
 0x326   : > { %v3423_v30 = vpop.eup %3422 }
 0x327   : > { %v467_v28 = vadd.f32 1e-06, %v459_v27  ;;  %v484_v32 = vmul.f32 %v3423_v30, %v3898_v20  ;;  %v2678_v27 = vadd.f32 -0.5, %v851_v24 }
 0x329   : > { %3426 = vrsqrt.f32 %v467_v28  ;;  %v496_v38 = vmul.f32 %v3865_v6, %v484_v32  ;;  %v3600_v28 = vmov 49  }
 0x32a   : > { %v3425_v26 = vpop.eup %3424 }
 0x32b   : > { %v485_v37 = vmul.f32 %v3425_v26, %v3901_v22  ;;  %v508_v36 = vadd.f32 %v3867_v8, %v496_v38 }
 0x32d   : > { %v497_v20 = vmul.f32 %v3865_v6, %v485_v37 }
 0x32f   : > { %v509_v46 = vadd.f32 %v3867_v8, %v497_v20 }
 0x333   : > { %v3427_v34 = vpop.eup %3426 }
 0x334   : > { %v483_v29 = vmul.f32 %v3427_v34, %v3910_v25  ;;  %v452_v25 = vsel %vm346_vm0, %v432_v42, 0.0 }
 0x336   : > { %v495_v39 = vmul.f32 %v3865_v6, %v483_v29 }
 0x338   : > { %v507_v43 = vadd.f32 %v3867_v8, %v495_v39 }
 0x33a   : > { %2881 = vmatmul.mubr.msk.f32.vlgmr.msra.gmra.mrb[0].mxu0 %vm346_vm0, %v507_v43 }
 0x33b   : > { %2883 = vmatprep.mubr.msk.f32.mxu0 %vm346_vm0, %v508_v36  ;;  %v4003_v22 = vpop.f32.mrb[2].mxu1  ;;  %2908 = vmatpush3.msk.msra.mxu0 %vm938_vm1, %v846_v10 }
 0x33c   : > { %v4009_v45 = vpop.f32.mrb[3].mxu1  ;;  %453 = vadd.xlane.f32.xlu0 %v452_v25 }
 0x33e   : > { %2884 = vmatmul.mubr.msk.f32.gmra.mrb[2].mxu0 %vm346_vm0, %v509_v46 }
 0x33f   : > { %v4013_v49 = vpop.f32.mrb[4].mxu1 }
 0x340   : > { %v4015_v50 = vpop.f32.mrb[5].mxu1 }
 0x345   : > { %456 = vadd.xlane.f32.xlu1 %v455_v55 }
 0x352   : > { %v781_v56 = vpop.permute.xlu1 %780  ;;  %v805_v59 = vpop.permute.xlu0 %804 }
 0x353   : > { %v785_v41 = vsub.f32 %v3875_v16, %v781_v56  ;;  %v809_v11 = vsub.f32 %v3875_v16, %v805_v59 }
 0x355   : > { %v788_v58 = vmul.f32 1.442695, %v785_v41  ;;  %v812_v14 = vmul.f32 1.442695, %v809_v11 }
 0x356   : > { %v793_v5 = vpop.permute.xlu1 %792 }
 0x357   : > { %3428 = vpow2.f32 %v788_v58  ;;  %v797_v33 = vsub.f32 %v3875_v16, %v793_v5 }
 0x359   : > { %v800_v7 = vmul.f32 1.442695, %v797_v33 }
 0x35a   : > { %v779_v60 = vpop.permute.xlu0 %778 }
 0x35b   : > { %v784_v4 = vsub.f32 %v3877_v18, %v779_v60 }
 0x35d   : > { %v786_v62 = vmul.f32 1.442695, %v784_v4 }
 0x35f   : > { %3430 = vpow2.f32 %v786_v62 }
 0x360   : > { %3432 = vpow2.f32 %v800_v7 }
 0x361   : > { %v4023_v40 = vpop.eup %3428  ;;  %3434 = vpow2.f32 %v812_v14 }
 0x362   : > { %863 = vrot.lane.b32.xlu1 %v4023_v40, %s3593_s20 }
 0x366   : > { %865 = vrot.lane.b32.xlu1 %v3877_v18, %s3594_s21 }
 0x369   : > { %v4028_v9 = vpop.eup %3430 }
 0x36a   : > { %867 = vrot.lane.b32.xlu1 %v3875_v16, %s3594_s21  ;;  %861 = vrot.lane.b32.xlu0 %v4028_v9, %s3593_s20  ;;  %v4038_v15 = vpop.eup %3432  ;;  %s3604_s20 = smov 96  }
 0x36b   : > { %v4047_v21 = vpop.eup %3434 }
 0x36e   : > { %871 = vrot.lane.b32.xlu1 %v3875_v16, %s3595_s22  ;;  %869 = vrot.lane.b32.xlu0 %v3877_v18, %s3595_s22  ;;  %s3605_s22 = smov 88  }
 0x372   : > { %875 = vrot.lane.b32.xlu1 %v4038_v15, %s3596_s23 }
 0x376   : > { %879 = vrot.lane.b32.xlu1 %v3875_v16, %s3597_s9 }
 0x37a   : > { %883 = vrot.lane.b32.xlu1 %v3875_v16, %s3598_s14 }
 0x37e   : > { %887 = vrot.lane.b32.xlu1 %v4047_v21, %s3599_s18 }
 0x382   : > { %1349 = vperm.xlu1 %3299, %v2679_v23  }
 0x386   : > { %3300 = vset.pattern.permute.xlu1 %v3600_v28 }
 0x387   : > { %1399 = vperm.xlu1 %3300, %v2678_v27  }
 0x394   : > { %v448_v30 = vpop.xlane.xlu0 %447 }
 0x395   : > { %v462_v31 = vmul.f32 0.020833334, %v448_v30  ;;  %v451_v26 = vpop.xlane.xlu1 %450 }
 0x396   : > { %v463_v32 = vmul.f32 0.020833334, %v451_v26 }
 0x397   : > { %v470_v34 = vadd.f32 1e-06, %v462_v31 }
 0x398   : > { %v471_v1 = vadd.f32 1e-06, %v463_v32  ;;  %v803_v0 = vpop.permute.xlu0 %802 }
 0x399   : > { %3436 = vrsqrt.f32 %v470_v34  ;;  %v791_v29 = vpop.permute.xlu1 %790  ;;  %v808_v63 = vsub.f32 %v3877_v18, %v803_v0 }
 0x39a   : > { %3438 = vrsqrt.f32 %v471_v1  ;;  %v796_v37 = vsub.f32 %v3877_v18, %v791_v29 }
 0x39b   : > { %v810_v46 = vmul.f32 1.442695, %v808_v63 }
 0x39c   : > { %v798_v38 = vmul.f32 1.442695, %v796_v37 }
 0x39d   : > { %v4053_v39 = vpop.permute.xlu1 %859 }
 0x39e   : > { %3440 = vpow2.f32 %v798_v38 }
 0x39f   : > { %3442 = vpow2.f32 %v810_v46  ;;  %v1359_v46 = vlaneseq }
 0x3a1   : > { %v4055_v42 = vpop.permute.xlu1 %857 }
 0x3a2   : > { %2686 = vmatmul.mubr.msk.f32.gmra.mrb[10].mxu1 %vm889_vm2, %v4055_v42 }
 0x3a3   : > { %v3437_v43 = vpop.eup %3436  ;;  %1042 = vmatprep.mubr.f32.mxu1 %v3584_v13 }
 0x3a4   : > { %v3439_v20 = vpop.eup %3438  ;;  %v486_v36 = vmul.f32 %v3437_v43, %v3964_v61 }
 0x3a5   : > { %v487_v25 = vmul.f32 %v3439_v20, %v3967_v2 }
 0x3a6   : > { %2687 = vmatmul.mubr.msk.f32.gmra.mrb[12].mxu1 %vm889_vm2, %v4053_v39  ;;  %v498_v53 = vmul.f32 %v3865_v6, %v486_v36 }
 0x3a7   : > { %1048 = vmatprep.mubr.f32.mxu1 %v3584_v13  ;;  %v499_v55 = vmul.f32 %v3865_v6, %v487_v25 }
 0x3a8   : > { %v4068_v56 = vpop.eup %3440  ;;  %v510_v41 = vadd.f32 %v3867_v8, %v498_v53 }
 0x3a9   : > { %873 = vrot.lane.b32.xlu0 %v4068_v56, %s3596_s23  ;;  %v511_v61 = vadd.f32 %v3867_v8, %v499_v55  ;;  %v4093_v59 = vpop.eup %3442  ;;  %v4189_v55 = vshrl.u32 %v1359_v46, 7  ;;  %s3614_s23 = smov 40  }
 0x3aa   : > { %2886 = vmatprep.mubr.msk.f32.mxu0 %vm346_vm0, %v510_v41  ;;  %2688 = vmatmul.mubr.msk.f32.gmra.mrb[14].mxu1 %vm889_vm2, %v3951_v54 }
 0x3ab   : > { %2887 = vmatmul.mubr.msk.f32.gmra.mrb[4].mxu0 %vm346_vm0, %v511_v61  ;;  %1054 = vmatprep.mubr.f32.mxu1 %v3584_v13  ;;  %v1361_v61 = vsub.s32 0, %v4189_v55 }
 0x3ad   : > { %877 = vrot.lane.b32.xlu0 %v3877_v18, %s3597_s9  ;;  %s312_s9 = sand.u32 1, %s3572_s25  }
 0x3ae   : > { %2689 = vmatmul.mubr.msk.f32.gmra.mrb[16].mxu1 %vm889_vm2, %v3937_v48 }
 0x3af   : > { %1060 = vmatprep.mubr.f32.mxu1 %v3584_v13 }
 0x3b1   : > { %v4084_v2 = vpop.f32.mrb[6].mxu1  ;;  %881 = vrot.lane.b32.xlu0 %v3877_v18, %s3598_s14  ;;  %s2657_s14 = sshll.u32 %s312_s9, 4 }
 0x3b2   : > { %v4088_v58 = vpop.f32.mrb[7].mxu1  ;;  %2690 = vmatmul.mubr.msk.f32.gmra.mrb[18].mxu1 %vm889_vm2, %v3959_v57 }
 0x3b3   : > { %1066 = vmatprep.mubr.f32.mxu1 %v3584_v13 }
 0x3b5   : > { %v4095_v60 = vpop.f32.mrb[8].mxu1  ;;  %885 = vrot.lane.b32.xlu0 %v4093_v59, %s3599_s18  ;;  %s2752_s18 = sshll.u32 %s3678_s28, 8  ;;  %s4529_s28 = scalar_lea.sflag [#allocation4], %s312_s9 }
 0x3b6   : > { %v4099_v4 = vpop.f32.mrb[9].mxu1  ;;  %2691 = vmatmul.mubr.msk.f32.gmra.mrb[20].mxu1 %vm889_vm2, %v3942_v51 }
 0x3b7   : > { %1072 = vmatprep.mubr.f32.mxu1 %v3584_v13 }
 0x3b9   : > { %1344 = vperm.xlu0 %3298, %v2678_v27  }
 0x3bd   : > { %3301 = vset.pattern.permute.xlu0 %v3600_v28 }
 0x3be   : > { %1403 = vperm.xlu0 %3301, %v2679_v23  }
 0x3c9   : > { %v454_v5 = vpop.xlane.xlu0 %453 }
 0x3ca   : > { %v464_v62 = vmul.f32 0.020833334, %v454_v5  ;;  %v1365_v5 = vsub.s32 1, %v4189_v55 }
 0x3cc   : > { %v472_v33 = vadd.f32 1e-06, %v464_v62 }
 0x3ce   : > { %3444 = vrsqrt.f32 %v472_v33  ;;  %v4197_v33 = vld [vmem:[#allocation5 + $0x6] ss:$8 sm:$0x7] }
 0x3d2   : > { %v457_v7 = vpop.xlane.xlu1 %456 }
 0x3d3   : > { %v465_v10 = vmul.f32 0.020833334, %v457_v7  ;;  %v4199_v7 = vld [vmem:[#allocation5 + $0x7] ss:$8 sm:$0x7] }
 0x3d5   : > { %v473_v11 = vadd.f32 1e-06, %v465_v10 }
 0x3d6   : > { %v864_v30 = vpop.permute.xlu1 %863 }
 0x3d7   : > { %3446 = vrsqrt.f32 %v473_v11  ;;  %v4206_v11 = vrot.slane %v4197_v33, %v1361_v61 }
 0x3d8   : > { %v3445_v14 = vpop.eup %3444 }
 0x3d9   : > { %v488_v17 = vmul.f32 %v3445_v14, %v3989_v35 }
 0x3da   : > { %v866_v28 = vpop.permute.xlu1 %865 }
 0x3db   : > { %v500_v24 = vmul.f32 %v3865_v6, %v488_v17  ;;  %v4211_v17 = vrot.slane %v4199_v7, %v1361_v61 }
 0x3dc   : > { %v862_v31 = vpop.permute.xlu0 %861 }
 0x3dd   : > { %2692 = vmatmul.mubr.msk.f32.gmra.mrb[22].mxu1 %vm889_vm2, %v862_v31  ;;  %v512_v27 = vadd.f32 %v3867_v8, %v500_v24 }
 0x3de   : > { %1078 = vmatprep.mubr.f32.mxu1 %v3584_v13  ;;  %v868_v34 = vpop.permute.xlu1 %867 }
 0x3df   : > { %2889 = vmatprep.mubr.msk.f32.mxu0 %vm346_vm0, %v512_v27 }
 0x3e0   : > { %v870_v1 = vpop.permute.xlu0 %869 }
 0x3e1   : > { %v3447_v23 = vpop.eup %3446  ;;  %2693 = vmatmul.mubr.msk.f32.gmra.mrb[24].mxu1 %vm889_vm2, %v864_v30 }
 0x3e2   : > { %1084 = vmatprep.mubr.f32.mxu1 %v3584_v13  ;;  %v489_v35 = vmul.f32 %v3447_v23, %v4007_v44 }
 0x3e4   : > { %v501_v26 = vmul.f32 %v3865_v6, %v489_v35  ;;  %v872_v6 = vpop.permute.xlu1 %871 }
 0x3e5   : > { %2694 = vmatmul.mubr.msk.f32.gmra.mrb[26].mxu1 %vm889_vm2, %v866_v28 }
 0x3e6   : > { %v513_v32 = vadd.f32 %v3867_v8, %v501_v26  ;;  %1090 = vmatprep.mubr.f32.mxu1 %v3584_v13  ;;  %v4150_v8 = vld [vmem:[#allocation2 + $0x4] ss:$0 sm:$0xff] }
 0x3e8   : > { %2890 = vmatmul.mubr.msk.f32.gmra.mrb[6].mxu0 %vm346_vm0, %v513_v32 }
 0x3e9   : > { %2695 = vmatmul.mubr.msk.f32.gmra.mrb[28].mxu1 %vm889_vm2, %v868_v34  ;;  %2909 = vmatprep.mubr.msk.f32.mxu0 %vm889_vm2, %v3877_v18 }
 0x3ea   : > { %1096 = vmatprep.mubr.f32.mxu1 %v3584_v13 }
 0x3ec   : > { %2910 = vmatmul.mubr.msk.f32.vlgmr.msra.gmra.mrb[8].mxu0 %vm889_vm2, %v3875_v16 }
 0x3ed   : > { %2696 = vmatmul.mubr.msk.f32.gmra.mrb[30].mxu1 %vm889_vm2, %v870_v1  ;;  %2912 = vmatprep.mubr.msk.f32.mxu0 %vm889_vm2, %v3944_v52 }
 0x3ee   : > { %1102 = vmatprep.mubr.f32.mxu1 %v3584_v13 }
 0x3f0   : > { %2913 = vmatmul.mubr.msk.f32.gmra.mrb[10].mxu0 %vm889_vm2, %v3935_v47 }
 0x3f1   : > { %2697 = vmatmul.mubr.msk.f32.gmra.mrb[32].mxu1 %vm889_vm2, %v872_v6  ;;  %2915 = vmatprep.mubr.msk.f32.mxu0 %vm889_vm2, %v4055_v42 }
 0x3f2   : > { %1108 = vmatprep.mubr.f32.mxu1 %v3584_v13 }
 0x3f4   : > { %2916 = vmatmul.mubr.msk.f32.gmra.mrb[12].mxu0 %vm889_vm2, %v4053_v39  ;;  %v876_v39 = vpop.permute.xlu1 %875 }
 0x3f5   : > { %2918 = vmatprep.mubr.msk.f32.mxu0 %vm889_vm2, %v3951_v54 }
 0x3f8   : > { %2919 = vmatmul.mubr.msk.f32.gmra.mrb[14].mxu0 %vm889_vm2, %v3937_v48  ;;  %v880_v42 = vpop.permute.xlu1 %879 }
 0x3f9   : > { %2921 = vmatprep.mubr.msk.f32.mxu0 %vm889_vm2, %v3959_v57 }
 0x3fc   : > { %2922 = vmatmul.mubr.msk.f32.gmra.mrb[16].mxu0 %vm889_vm2, %v3942_v51  ;;  %v884_v43 = vpop.permute.xlu1 %883 }
 0x3fd   : > { %2924 = vmatprep.mubr.msk.f32.mxu0 %vm889_vm2, %v862_v31  ;;  %v4221_v31 = vrot.slane %v4199_v7, %v1365_v5 }
 0x400   : > { %2925 = vmatmul.mubr.msk.f32.gmra.mrb[18].mxu0 %vm889_vm2, %v864_v30  ;;  %v888_v25 = vpop.permute.xlu1 %887  ;;  %v4216_v30 = vrot.slane %v4197_v33, %v1365_v5 }
 0x401   : > { %2927 = vmatprep.mubr.msk.f32.mxu0 %vm889_vm2, %v866_v28 }
 0x404   : > { %2928 = vmatmul.mubr.msk.f32.gmra.mrb[20].mxu0 %vm889_vm2, %v868_v34  ;;  %v4187_v53 = vpop.permute.xlu1 %1349 }
 0x405   : > { %2930 = vmatprep.mubr.msk.f32.mxu0 %vm889_vm2, %v870_v1  ;;  %v1355_v27 = vadd.f32 %v4187_v53, %v4013_v49  ;;  %v1356_v23 = vadd.f32 %v4187_v53, %v4015_v50 }
 0x407   : > { %v1377_v34 = vsub.f32 %v1355_v27, %v4206_v11  ;;  %v1378_v49 = vsub.f32 %v1356_v23, %v4216_v30 }
 0x408   : > { %2931 = vmatmul.mubr.msk.f32.gmra.mrb[22].mxu0 %vm889_vm2, %v872_v6  ;;  %v4195_v62 = vpop.permute.xlu1 %1399 }
 0x409   : > { %v1406_v14 = vadd.f32 %v4195_v62, %v4084_v2 }
 0x40b   : > { %v1428_v28 = vsub.f32 %v1406_v14, %v4211_v17 }
 0x40d   : > { %v2882_v16 = vpop.f32.mrb[0].mxu0  ;;  %v1434_v6 = vand.u32 2147483647, %v1428_v28 }
 0x40e   : > { %v620_v18 = vadd.f32 %v2882_v16, %v4150_v8  ;;  %v614_v47 = vpop.f32.mrb[1].mxu0 }
 0x40f   : > { %v615_v48 = vadd.f32 %v4150_v8, %v614_v47 }
 0x411   : > { %v2885_v51 = vpop.f32.mrb[2].mxu0  ;;  %v3098_v52 = vpack.c.bf16 %v620_v18, %v615_v48  ;;  %v4154_v54 = vpack.i.bf16 %v620_v18, %v615_v48  ;;  %v1383_v48 = vand.u32 2147483647, %v1377_v34 }
 0x412   : > { %v630_v57 = vadd.f32 %v2885_v51, %v4150_v8  ;;  %v624_v44 = vpop.f32.mrb[3].mxu0  ;;  %v1384_v51 = vand.u32 2147483647, %v1378_v49 }
 0x413   : > { %v625_v29 = vadd.f32 %v4150_v8, %v624_v44  ;;  %3099 = vmatprep.subr.bf16.mxu0 %v3098_v52  ;;  %3303 = vrot.lane.b32.xlu1 %v4154_v54, %s3601_s17 }
 0x414   : > { %3101 = vmatpush3.bf16.msra.mxu0 %v3098_v52  ;;  %v1440_v52 = vsub.f32 1.0, %v1434_v6 }
 0x415   : > { %v4160_v37 = vpack.i.bf16 %v630_v57, %v625_v29  ;;  %v3102_v38 = vpack.c.bf16 %v630_v57, %v625_v29 }
 0x417   : > { %3308 = vrot.lane.b32.xlu1 %v4160_v37, %s3601_s17  ;;  %3103 = vmatprep.subr.bf16.mxu0 %v3102_v38 }
 0x418   : > { %3105 = vmatpush3.bf16.msra.mxu0 %v3102_v38  ;;  %v1389_v38 = vsub.f32 1.0, %v1383_v48 }
 0x41b   : > { %v874_v0 = vpop.permute.xlu0 %873 }
 0x41c   : > { %2698 = vmatmul.mubr.msk.f32.gmra.mrb[34].mxu1 %vm889_vm2, %v874_v0  ;;  %2933 = vmatprep.mubr.msk.f32.mxu0 %vm889_vm2, %v874_v0 }
 0x41d   : > { %2934 = vmatmul.mubr.msk.f32.gmra.mrb[24].mxu0 %vm889_vm2, %v876_v39  ;;  %1114 = vmatprep.mubr.f32.mxu1 %v3584_v13 }
 0x41f   : > { %v878_v63 = vpop.permute.xlu0 %877 }
 0x420   : > { %2699 = vmatmul.mubr.msk.f32.gmra.mrb[36].mxu1 %vm889_vm2, %v876_v39  ;;  %2936 = vmatprep.mubr.msk.f32.mxu0 %vm889_vm2, %v878_v63 }
 0x421   : > { %2937 = vmatmul.mubr.msk.f32.gmra.mrb[26].mxu0 %vm889_vm2, %v880_v42  ;;  %1120 = vmatprep.mubr.f32.mxu1 %v3584_v13 }
 0x423   : > { %v882_v20 = vpop.permute.xlu0 %881 }
 0x424   : > { %2700 = vmatmul.mubr.msk.f32.gmra.mrb[38].mxu1 %vm889_vm2, %v878_v63  ;;  %2939 = vmatprep.mubr.msk.f32.mxu0 %vm889_vm2, %v882_v20  ;;  %v1446_v63 = vmax.f32 %v1440_v52, 0.0 }
 0x425   : > { %2940 = vmatmul.mubr.msk.f32.gmra.mrb[28].mxu0 %vm889_vm2, %v884_v43  ;;  %1126 = vmatprep.mubr.f32.mxu1 %v3584_v13 }
 0x427   : > { %v886_v36 = vpop.permute.xlu0 %885 }
 0x428   : > { %2701 = vmatmul.mubr.msk.f32.gmra.mrb[40].mxu1 %vm889_vm2, %v880_v42  ;;  %2942 = vmatprep.mubr.msk.f32.mxu0 %vm889_vm2, %v886_v36  ;;  %v1390_v42 = vsub.f32 1.0, %v1384_v51 }
 0x429   : > { %2943 = vmatmul.mubr.msk.f32.gmra.mrb[30].mxu0 %vm889_vm2, %v888_v25  ;;  %1132 = vmatprep.mubr.f32.mxu1 %v3584_v13 }
 0x42c   : > { %2702 = vmatmul.mubr.msk.f32.gmra.mrb[42].mxu1 %vm889_vm2, %v882_v20 }
 0x42d   : > { %1138 = vmatprep.mubr.f32.mxu1 %v3584_v13 }
 0x430   : > { %2703 = vmatmul.mubr.msk.f32.gmra.mrb[44].mxu1 %vm889_vm2, %v884_v43 }
 0x431   : > { %1144 = vmatprep.mubr.f32.mxu1 %v3584_v13 }
 0x434   : > { %2704 = vmatmul.mubr.msk.f32.gmra.mrb[46].mxu1 %vm889_vm2, %v886_v36 }
 0x435   : > { %1150 = vmatprep.mubr.f32.mxu1 %v3584_v13 }
 0x438   : > { %2705 = vmatmul.mubr.msk.f32.gmra.mrb[48].mxu1 %vm889_vm2, %v888_v25  ;;  %v4191_v41 = vpop.permute.xlu0 %1344 }
 0x439   : > { %v1352_v13 = vadd.f32 %v4191_v41, %v4003_v22  ;;  %v1353_v10 = vadd.f32 %v4191_v41, %v4009_v45  ;;  %v1407_v22 = vadd.f32 %v4195_v62, %v4088_v58 }
 0x43b   : > { %v1374_v45 = vsub.f32 %v1352_v13, %v4206_v11  ;;  %v1375_v2 = vsub.f32 %v1353_v10, %v4216_v30  ;;  %v1429_v58 = vsub.f32 %v1407_v22, %v4221_v31  ;;  %v1395_v13 = vmax.f32 %v1389_v38, 0.0 }
 0x43c   : > { %v1396_v22 = vmax.f32 %v1390_v42, 0.0 }
 0x43d   : > { %v4213_v24 = vpop.permute.xlu0 %1403  ;;  %v1380_v32 = vand.u32 2147483647, %v1374_v45  ;;  %v1381_v1 = vand.u32 2147483647, %v1375_v2  ;;  %v1435_v50 = vand.u32 2147483647, %v1429_v58 }
 0x43e   : > { %v1409_v35 = vadd.f32 %v4213_v24, %v4095_v60  ;;  %v1410_v26 = vadd.f32 %v4213_v24, %v4099_v4 }
 0x43f   : > { %v1386_v47 = vsub.f32 1.0, %v1380_v32  ;;  %v1387_v60 = vsub.f32 1.0, %v1381_v1  ;;  %v1441_v44 = vsub.f32 1.0, %v1435_v50 }
 0x440   : > { %v1431_v16 = vsub.f32 %v1409_v35, %v4211_v17  ;;  %v1432_v18 = vsub.f32 %v1410_v26, %v4221_v31 }
 0x441   : > { %v1392_v29 = vmax.f32 %v1386_v47, 0.0  ;;  %v1393_v0 = vmax.f32 %v1387_v60, 0.0  ;;  %v1447_v25 = vmax.f32 %v1441_v44, 0.0 }
 0x442   : > { %v1437_v57 = vand.u32 2147483647, %v1431_v16  ;;  %v1438_v4 = vand.u32 2147483647, %v1432_v18 }
 0x444   : > { %v1443_v36 = vsub.f32 1.0, %v1437_v57  ;;  %v1444_v61 = vsub.f32 1.0, %v1438_v4 }
 0x446   : > { %v1449_v45 = vmax.f32 %v1443_v36, 0.0  ;;  %v1450_v23 = vmax.f32 %v1444_v61, 0.0 }
 0x475   : > { %v1038_v39 = vpop.f32.mrb[10].mxu1 }
 0x476   : > { %v1452_v43 = vmul.f32 %v1392_v29, %v1038_v39  ;;  %v1040_v20 = vpop.f32.mrb[11].mxu1 }
 0x477   : > { %v1453_v46 = vmul.f32 %v1393_v0, %v1040_v20 }
 0x478   : > { %v4239_v5 = vmul.f32 %v1452_v43, %v1446_v63 }
 0x479   : > { %v4241_v10 = vmul.f32 %v1453_v46, %v1447_v25  ;;  %v1044_v14 = vpop.f32.mrb[12].mxu1 }
 0x47a   : > { %v1455_v27 = vmul.f32 %v1395_v13, %v1044_v14  ;;  %v1046_v2 = vpop.f32.mrb[13].mxu1 }
 0x47b   : > { %v1456_v28 = vmul.f32 %v1396_v22, %v1046_v2 }
 0x47c   : > { %v4243_v35 = vmul.f32 %v1455_v27, %v1449_v45 }
 0x47d   : > { %v4245_v58 = vmul.f32 %v1456_v28, %v1450_v23  ;;  %v1050_v26 = vpop.f32.mrb[14].mxu1 }
 0x47e   : > { %v2888_v32 = vpop.f32.mrb[4].mxu0  ;;  %v1052_v34 = vpop.f32.mrb[15].mxu1  ;;  %v1464_v57 = vadd.f32 %v4191_v41, %v1050_v26 }
 0x47f   : > { %v640_v1 = vadd.f32 %v2888_v32, %v4150_v8  ;;  %v634_v49 = vpop.f32.mrb[5].mxu0  ;;  %v1465_v44 = vadd.f32 %v4191_v41, %v1052_v34 }
 0x480   : > { %v635_v6 = vadd.f32 %v4150_v8, %v634_v49  ;;  %v1470_v38 = vsub.f32 %v1464_v57, %v4206_v11 }
 0x481   : > { %v1056_v16 = vpop.f32.mrb[16].mxu1  ;;  %v1471_v0 = vsub.f32 %v1465_v44, %v4216_v30 }
 0x482   : > { %v1058_v50 = vpop.f32.mrb[17].mxu1  ;;  %v4249_v18 = vpack.i.bf16 %v640_v1, %v635_v6  ;;  %v3106_v47 = vpack.c.bf16 %v640_v1, %v635_v6  ;;  %v1467_v39 = vadd.f32 %v4187_v53, %v1056_v16  ;;  %v1476_v25 = vand.u32 2147483647, %v1470_v38 }
 0x483   : > { %v1468_v42 = vadd.f32 %v4187_v53, %v1058_v50  ;;  %v1477_v61 = vand.u32 2147483647, %v1471_v0 }
 0x484   : > { %3313 = vrot.lane.b32.xlu0 %v4249_v18, %s3601_s17  ;;  %3107 = vmatprep.subr.bf16.mxu0 %v3106_v47  ;;  %v1473_v46 = vsub.f32 %v1467_v39, %v4206_v11  ;;  %v1482_v23 = vsub.f32 1.0, %v1476_v25 }
 0x485   : > { %v1062_v48 = vpop.f32.mrb[18].mxu1  ;;  %3109 = vmatpush3.bf16.msra.mxu0 %v3106_v47  ;;  %v1474_v13 = vsub.f32 %v1468_v42, %v4216_v30  ;;  %v1483_v26 = vsub.f32 1.0, %v1477_v61 }
 0x486   : > { %v1064_v60 = vpop.f32.mrb[19].mxu1  ;;  %v1494_v4 = vadd.f32 %v4195_v62, %v1062_v48  ;;  %v1479_v2 = vand.u32 2147483647, %v1473_v46  ;;  %v1488_v6 = vmax.f32 %v1482_v23, 0.0  ;;  %v3304_v23 = vpop.permute.xlu1 %3303 }
 0x487   : > { %v1495_v29 = vadd.f32 %v4195_v62, %v1064_v60  ;;  %v1480_v28 = vand.u32 2147483647, %v1474_v13  ;;  %v1489_v47 = vmax.f32 %v1483_v26, 0.0 }
 0x488   : > { %3323 = vrot.lane.b32.xlu0 %v4154_v54, %s3602_s13  ;;  %v1500_v63 = vsub.f32 %v1494_v4, %v4211_v17  ;;  %v1485_v16 = vsub.f32 1.0, %v1479_v2 }
 0x489   : > { %v1068_v51 = vpop.f32.mrb[20].mxu1  ;;  %v1501_v20 = vsub.f32 %v1495_v29, %v4221_v31  ;;  %v1486_v48 = vsub.f32 1.0, %v1480_v28  ;;  %v1369_v28 = vsub.s32 2, %v4189_v55 }
 0x48a   : > { %v1070_v52 = vpop.f32.mrb[21].mxu1  ;;  %v1497_v43 = vadd.f32 %v4213_v24, %v1068_v51  ;;  %v1506_v14 = vand.u32 2147483647, %v1500_v63  ;;  %v1491_v39 = vmax.f32 %v1485_v16, 0.0 }
 0x48b   : > { %v1498_v36 = vadd.f32 %v4213_v24, %v1070_v52  ;;  %v1507_v45 = vand.u32 2147483647, %v1501_v20  ;;  %v1492_v63 = vmax.f32 %v1486_v48, 0.0  ;;  %v4297_v16 = vrot.slane %v4197_v33, %v1369_v28 }
 0x48c   : > { %3333 = vrot.lane.b32.xlu0 %v4160_v37, %s3602_s13  ;;  %v1503_v22 = vsub.f32 %v1497_v43, %v4211_v17  ;;  %v1512_v32 = vsub.f32 1.0, %v1506_v14 }
 0x48d   : > { %v1504_v27 = vsub.f32 %v1498_v36, %v4221_v31  ;;  %v1513_v1 = vsub.f32 1.0, %v1507_v45 }
 0x48e   : > { %v1509_v34 = vand.u32 2147483647, %v1503_v22  ;;  %v1518_v60 = vmax.f32 %v1512_v32, 0.0 }
 0x48f   : > { %v1510_v49 = vand.u32 2147483647, %v1504_v27  ;;  %v1519_v44 = vmax.f32 %v1513_v1, 0.0  ;;  %v3306_v1 = vunpack.i.h.bf16 %v3304_v23 }
 0x490   : > { %v1515_v51 = vsub.f32 1.0, %v1509_v34 }
 0x491   : > { %v1516_v4 = vsub.f32 1.0, %v1510_v49  ;;  %v3305_v49 = vunpack.i.l.bf16 %v3304_v23 }
 0x492   : > { %v1521_v43 = vmax.f32 %v1515_v51, 0.0 }
 0x493   : > { %v1522_v46 = vmax.f32 %v1516_v4, 0.0  ;;  %v4304_v51 = vpack.c.bf16 %v3306_v1, %v3305_v49 }
 0x4b0   : > { %v1074_v50 = vpop.f32.mrb[22].mxu1 }
 0x4b1   : > { %v1524_v52 = vmul.f32 %v1488_v6, %v1074_v50  ;;  %v1076_v57 = vpop.f32.mrb[23].mxu1 }
 0x4b2   : > { %v1525_v29 = vmul.f32 %v1489_v47, %v1076_v57  ;;  %v4313_v57 = vrot.slane %v4199_v7, %v1369_v28 }
 0x4b3   : > { %v1530_v38 = vmul.f32 %v1524_v52, %v1518_v60 }
 0x4b4   : > { %v1531_v0 = vmul.f32 %v1525_v29, %v1519_v44  ;;  %v1080_v42 = vpop.f32.mrb[24].mxu1 }
 0x4b5   : > { %v4274_v20 = vadd.f32 %v1530_v38, %v4239_v5  ;;  %v1527_v36 = vmul.f32 %v1491_v39, %v1080_v42  ;;  %v1082_v25 = vpop.f32.mrb[25].mxu1 }
 0x4b6   : > { %v4277_v61 = vadd.f32 %v1531_v0, %v4241_v10  ;;  %v1528_v13 = vmul.f32 %v1492_v63, %v1082_v25 }
 0x4b7   : > { %v1533_v14 = vmul.f32 %v1527_v36, %v1521_v43 }
 0x4b8   : > { %v1534_v22 = vmul.f32 %v1528_v13, %v1522_v46  ;;  %v4279_v45 = vpop.f32.mrb[26].mxu1 }
 0x4b9   : > { %v4282_v27 = vadd.f32 %v1533_v14, %v4243_v35  ;;  %v4284_v2 = vpop.f32.mrb[27].mxu1 }
 0x4ba   : > { %v4287_v5 = vadd.f32 %v1534_v22, %v4245_v58 }
 0x4bb   : > { %v2891_v26 = vpop.f32.mrb[6].mxu0 }
 0x4bc   : > { %v650_v10 = vadd.f32 %v2891_v26, %v4150_v8  ;;  %v644_v32 = vpop.f32.mrb[7].mxu0  ;;  %v4291_v34 = vpop.f32.mrb[28].mxu1 }
 0x4bd   : > { %v645_v6 = vadd.f32 %v4150_v8, %v644_v32  ;;  %v4294_v35 = vpop.f32.mrb[29].mxu1 }
 0x4bf   : > { %v2911_v50 = vpop.f32.mrb[8].mxu0  ;;  %v4299_v58 = vpack.i.bf16 %v650_v10, %v645_v6  ;;  %v3110_v47 = vpack.c.bf16 %v650_v10, %v645_v6 }
 0x4c0   : > { %v1357_v55 = vadd.f32 %v2911_v50, %v4187_v53  ;;  %v4302_v48 = vpop.f32.mrb[30].mxu1  ;;  %v1223_v60 = vpop.f32.mrb[9].mxu0 }
 0x4c1   : > { %v1354_v52 = vadd.f32 %v4191_v41, %v1223_v60  ;;  %3318 = vrot.lane.b32.xlu1 %v4299_v58, %s3601_s17  ;;  %v4309_v8 = vpop.f32.mrb[31].mxu1  ;;  %3111 = vmatprep.subr.bf16.mxu0 %v3110_v47  ;;  %s314_s17 = scalar_lea.vmem [#allocation7], %s2657_s14 }
 0x4c2   : > { %v1379_v33 = vsub.f32 %v1357_v55, %v4297_v16  ;;  %3113 = vmatpush3.bf16.msra.mxu0 %v3110_v47 }
 0x4c3   : > { %v1376_v44 = vsub.f32 %v1354_v52, %v4297_v16  ;;  %v2914_v4 = vpop.f32.mrb[10].mxu0  ;;  %3115 = vmatprep.subr.bf16.mxu0 %v4304_v51 }
 0x4c4   : > { %v1385_v29 = vand.u32 2147483647, %v1379_v33  ;;  %v1411_v38 = vadd.f32 %v2914_v4, %v4213_v24  ;;  %v4318_v39 = vpop.f32.mrb[32].mxu1  ;;  %v1233_v0 = vpop.f32.mrb[11].mxu0 }
 0x4c5   : > { %v1382_v42 = vand.u32 2147483647, %v1376_v44  ;;  %v1408_v63 = vadd.f32 %v4195_v62, %v1233_v0  ;;  %3328 = vrot.lane.b32.xlu1 %v4154_v54, %s3594_s21  ;;  %v4323_v43 = vpop.f32.mrb[33].mxu1 }
 0x4c6   : > { %v1433_v7 = vsub.f32 %v1411_v38, %v4313_v57  ;;  %v1391_v36 = vsub.f32 1.0, %v1385_v29 }
 0x4c7   : > { %v1430_v25 = vsub.f32 %v1408_v63, %v4313_v57  ;;  %v2917_v46 = vpop.f32.mrb[12].mxu0  ;;  %v1388_v13 = vsub.f32 1.0, %v1382_v42 }
 0x4c8   : > { %v1439_v14 = vand.u32 2147483647, %v1433_v7  ;;  %v1397_v22 = vmax.f32 %v1391_v36, 0.0  ;;  %v1243_v23 = vpop.f32.mrb[13].mxu0 }
 0x4c9   : > { %v1436_v28 = vand.u32 2147483647, %v1430_v25  ;;  %v1394_v26 = vmax.f32 %v1388_v13, 0.0  ;;  %3338 = vrot.lane.b32.xlu1 %v4160_v37, %s3594_s21 }
 0x4ca   : > { %v1445_v10 = vsub.f32 1.0, %v1439_v14  ;;  %v1457_v32 = vmul.f32 %v2917_v46, %v1397_v22 }
 0x4cb   : > { %v1442_v1 = vsub.f32 1.0, %v1436_v28  ;;  %v1454_v49 = vmul.f32 %v1394_v26, %v1243_v23  ;;  %v2920_v6 = vpop.f32.mrb[14].mxu0 }
 0x4cc   : > { %v1451_v50 = vmax.f32 %v1445_v10, 0.0  ;;  %v1469_v47 = vadd.f32 %v2920_v6, %v4187_v53  ;;  %v1253_v55 = vpop.f32.mrb[15].mxu0 }
 0x4cd   : > { %v1448_v60 = vmax.f32 %v1442_v1, 0.0  ;;  %v1466_v52 = vadd.f32 %v4191_v41, %v1253_v55 }
 0x4ce   : > { %v1463_v33 = vmul.f32 %v1457_v32, %v1451_v50  ;;  %v1475_v44 = vsub.f32 %v1469_v47, %v4297_v16 }
 0x4cf   : > { %v1460_v4 = vmul.f32 %v1454_v49, %v1448_v60  ;;  %v1472_v29 = vsub.f32 %v1466_v52, %v4297_v16  ;;  %v2923_v38 = vpop.f32.mrb[16].mxu0 }
 0x4d0   : > { %v1481_v0 = vand.u32 2147483647, %v1475_v44  ;;  %v1499_v42 = vadd.f32 %v2923_v38, %v4213_v24  ;;  %v1263_v63 = vpop.f32.mrb[17].mxu0 }
 0x4d1   : > { %v1478_v7 = vand.u32 2147483647, %v1472_v29  ;;  %v1496_v36 = vadd.f32 %v4195_v62, %v1263_v63 }
 0x4d2   : > { %v1505_v25 = vsub.f32 %v1499_v42, %v4313_v57  ;;  %v1487_v46 = vsub.f32 1.0, %v1481_v0 }
 0x4d3   : > { %v1502_v13 = vsub.f32 %v1496_v36, %v4313_v57  ;;  %v2926_v14 = vpop.f32.mrb[18].mxu0  ;;  %v1484_v22 = vsub.f32 1.0, %v1478_v7  ;;  %v1542_v7 = vadd.f32 %v4191_v41, %v4279_v45  ;;  %v1543_v36 = vadd.f32 %v4191_v41, %v4284_v2 }
 0x4d4   : > { %v1511_v23 = vand.u32 2147483647, %v1505_v25  ;;  %v1493_v28 = vmax.f32 %v1487_v46, 0.0  ;;  %v1273_v26 = vpop.f32.mrb[19].mxu0  ;;  %v1572_v46 = vadd.f32 %v4195_v62, %v4302_v48  ;;  %v1545_v45 = vadd.f32 %v4187_v53, %v4291_v34 }
 0x4d5   : > { %v1508_v10 = vand.u32 2147483647, %v1502_v13  ;;  %v1490_v32 = vmax.f32 %v1484_v22, 0.0  ;;  %v1549_v2 = vsub.f32 %v1543_v36, %v4216_v30  ;;  %v1575_v48 = vadd.f32 %v4213_v24, %v4318_v39 }
 0x4d6   : > { %v1517_v1 = vsub.f32 1.0, %v1511_v23  ;;  %v1529_v49 = vmul.f32 %v2926_v14, %v1493_v28  ;;  %v1546_v23 = vadd.f32 %v4187_v53, %v4294_v35 }
 0x4d7   : > { %v1514_v6 = vsub.f32 1.0, %v1508_v10  ;;  %v1526_v50 = vmul.f32 %v1490_v32, %v1273_v26  ;;  %v2929_v47 = vpop.f32.mrb[20].mxu0  ;;  %v1576_v26 = vadd.f32 %v4213_v24, %v4323_v43 }
 0x4d8   : > { %v1523_v55 = vmax.f32 %v1517_v1, 0.0  ;;  %v1283_v60 = vpop.f32.mrb[21].mxu0  ;;  %v1547_v25 = vadd.f32 %v2929_v47, %v4187_v53  ;;  %v1552_v39 = vsub.f32 %v1546_v23, %v4216_v30 }
 0x4d9   : > { %v1520_v52 = vmax.f32 %v1514_v6, 0.0  ;;  %v1544_v13 = vadd.f32 %v4191_v41, %v1283_v60  ;;  %v1555_v6 = vand.u32 2147483647, %v1549_v2  ;;  %v1582_v43 = vsub.f32 %v1576_v26, %v4221_v31 }
 0x4da   : > { %v1535_v44 = vmul.f32 %v1529_v49, %v1523_v55  ;;  %v1553_v28 = vsub.f32 %v1547_v25, %v4297_v16  ;;  %v1551_v49 = vsub.f32 %v1545_v45, %v4206_v11 }
 0x4db   : > { %v1532_v29 = vmul.f32 %v1526_v50, %v1520_v52  ;;  %v2932_v38 = vpop.f32.mrb[22].mxu0  ;;  %v1550_v10 = vsub.f32 %v1544_v13, %v4297_v16  ;;  %v1581_v50 = vsub.f32 %v1575_v48, %v4211_v17  ;;  %v1561_v25 = vsub.f32 1.0, %v1555_v6 }
 0x4dc   : > { %v4337_v0 = vadd.f32 %v1535_v44, %v1463_v33  ;;  %v1293_v42 = vpop.f32.mrb[23].mxu0  ;;  %v1573_v33 = vadd.f32 %v4195_v62, %v4309_v8  ;;  %v1577_v14 = vadd.f32 %v2932_v38, %v4213_v24  ;;  %v1578_v8 = vsub.f32 %v1572_v46, %v4211_v17 }
 0x4dd   : > { %v4339_v63 = vadd.f32 %v1532_v29, %v1460_v4  ;;  %v1548_v4 = vsub.f32 %v1542_v7, %v4206_v11  ;;  %v1574_v22 = vadd.f32 %v4195_v62, %v1293_v42  ;;  %v1559_v47 = vand.u32 2147483647, %v1553_v28 }
 0x4de   : > { %v1579_v34 = vsub.f32 %v1573_v33, %v4221_v31  ;;  %v1583_v32 = vsub.f32 %v1577_v14, %v4313_v57  ;;  %v1584_v55 = vand.u32 2147483647, %v1578_v8  ;;  %v1556_v60 = vand.u32 2147483647, %v1550_v10 }
 0x4df   : > { %v1554_v1 = vand.u32 2147483647, %v1548_v4  ;;  %v1580_v35 = vsub.f32 %v1574_v22, %v4313_v57  ;;  %v1557_v29 = vand.u32 2147483647, %v1551_v49  ;;  %v1558_v7 = vand.u32 2147483647, %v1552_v39 }
 0x4e0   : > { %v1585_v52 = vand.u32 2147483647, %v1579_v34  ;;  %v1589_v44 = vand.u32 2147483647, %v1583_v32  ;;  %v1587_v36 = vand.u32 2147483647, %v1581_v50 }
 0x4e1   : > { %v1586_v38 = vand.u32 2147483647, %v1580_v35  ;;  %v1560_v42 = vsub.f32 1.0, %v1554_v1  ;;  %v1565_v46 = vsub.f32 1.0, %v1559_v47  ;;  %v1590_v13 = vsub.f32 1.0, %v1584_v55 }
 0x4e2   : > { %v1588_v33 = vand.u32 2147483647, %v1582_v43  ;;  %v1562_v14 = vsub.f32 1.0, %v1556_v60  ;;  %v1591_v4 = vsub.f32 1.0, %v1585_v52  ;;  %v1595_v45 = vsub.f32 1.0, %v1589_v44 }
 0x4e3   : > { %v1592_v22 = vsub.f32 1.0, %v1586_v38  ;;  %v1566_v2 = vmax.f32 %v1560_v42, 0.0  ;;  %v1563_v23 = vsub.f32 1.0, %v1557_v29  ;;  %v1593_v48 = vsub.f32 1.0, %v1587_v36 }
 0x4e4   : > { %v1567_v8 = vmax.f32 %v1561_v25, 0.0  ;;  %v1571_v26 = vmax.f32 %v1565_v46, 0.0  ;;  %v1564_v10 = vsub.f32 1.0, %v1558_v7  ;;  %v1596_v34 = vmax.f32 %v1590_v13, 0.0 }
 0x4e5   : > { %v1594_v32 = vsub.f32 1.0, %v1588_v33  ;;  %v1568_v6 = vmax.f32 %v1562_v14, 0.0  ;;  %v1597_v39 = vmax.f32 %v1591_v4, 0.0  ;;  %v1601_v50 = vmax.f32 %v1595_v45, 0.0 }
 0x4e6   : > { %v1598_v60 = vmax.f32 %v1592_v22, 0.0  ;;  %v1569_v29 = vmax.f32 %v1563_v23, 0.0  ;;  %v1599_v38 = vmax.f32 %v1593_v48, 0.0  ;;  %v1570_v7 = vmax.f32 %v1564_v10, 0.0 }
 0x4e7   : > { %v1600_v46 = vmax.f32 %v1594_v32, 0.0 }
 0x4ef   : > { %v1110_v28 = vpop.f32.mrb[34].mxu1 }
 0x4f0   : > { %v1602_v1 = vmul.f32 %v1566_v2, %v1110_v28  ;;  %v1112_v49 = vpop.f32.mrb[35].mxu1  ;;  %v2935_v35 = vpop.f32.mrb[24].mxu0 }
 0x4f1   : > { %v1603_v47 = vmul.f32 %v1567_v8, %v1112_v49  ;;  %v1607_v55 = vmul.f32 %v2935_v35, %v1571_v26  ;;  %v1303_v43 = vpop.f32.mrb[25].mxu0 }
 0x4f2   : > { %v1608_v52 = vmul.f32 %v1602_v1, %v1596_v34  ;;  %v1604_v44 = vmul.f32 %v1568_v6, %v1303_v43 }
 0x4f3   : > { %v1609_v42 = vmul.f32 %v1603_v47, %v1597_v39  ;;  %v1613_v36 = vmul.f32 %v1607_v55, %v1601_v50  ;;  %v1116_v25 = vpop.f32.mrb[36].mxu1 }
 0x4f4   : > { %v4374_v13 = vadd.f32 %v1608_v52, %v4274_v20  ;;  %v1610_v33 = vmul.f32 %v1604_v44, %v1598_v60  ;;  %v1605_v14 = vmul.f32 %v1569_v29, %v1116_v25  ;;  %v1118_v4 = vpop.f32.mrb[37].mxu1  ;;  %v2938_v45 = vpop.f32.mrb[26].mxu0 }
 0x4f5   : > { %v4377_v2 = vadd.f32 %v1609_v42, %v4277_v61  ;;  %v4380_v22 = vadd.f32 %v1613_v36, %v4337_v0  ;;  %v1606_v23 = vmul.f32 %v1570_v7, %v1118_v4  ;;  %v1625_v48 = vadd.f32 %v2938_v45, %v4187_v53  ;;  %v1313_v28 = vpop.f32.mrb[27].mxu0 }
 0x4f6   : > { %v4384_v8 = vadd.f32 %v1610_v33, %v4339_v63  ;;  %v1611_v26 = vmul.f32 %v1605_v14, %v1599_v38  ;;  %v1622_v20 = vadd.f32 %v4191_v41, %v1313_v28 }
 0x4f7   : > { %v1612_v10 = vmul.f32 %v1606_v23, %v1600_v46  ;;  %v1631_v34 = vsub.f32 %v1625_v48, %v4297_v16  ;;  %v1122_v32 = vpop.f32.mrb[38].mxu1 }
 0x4f8   : > { %v4389_v61 = vadd.f32 %v1611_v26, %v4282_v27  ;;  %v1628_v0 = vsub.f32 %v1622_v20, %v4297_v16  ;;  %v1620_v1 = vadd.f32 %v4191_v41, %v1122_v32  ;;  %v1124_v49 = vpop.f32.mrb[39].mxu1  ;;  %v2941_v35 = vpop.f32.mrb[28].mxu0 }
 0x4f9   : > { %v4394_v6 = vadd.f32 %v1612_v10, %v4287_v5  ;;  %v1637_v63 = vand.u32 2147483647, %v1631_v34  ;;  %v1621_v39 = vadd.f32 %v4191_v41, %v1124_v49  ;;  %v1323_v50 = vpop.f32.mrb[29].mxu0  ;;  %v1655_v43 = vadd.f32 %v2941_v35, %v4213_v24 }
 0x4fa   : > { %v1634_v47 = vand.u32 2147483647, %v1628_v0  ;;  %v1626_v55 = vsub.f32 %v1620_v1, %v4206_v11  ;;  %v1652_v27 = vadd.f32 %v4195_v62, %v1323_v50 }
 0x4fb   : > { %v1627_v16 = vsub.f32 %v1621_v39, %v4216_v30  ;;  %v1128_v60 = vpop.f32.mrb[40].mxu1  ;;  %v1643_v52 = vsub.f32 1.0, %v1637_v63  ;;  %v1661_v44 = vsub.f32 %v1655_v43, %v4313_v57 }
 0x4fc   : > { %v1658_v5 = vsub.f32 %v1652_v27, %v4313_v57  ;;  %v1623_v29 = vadd.f32 %v4187_v53, %v1128_v60  ;;  %v1130_v38 = vpop.f32.mrb[41].mxu1  ;;  %v2944_v41 = vpop.f32.mrb[30].mxu0  ;;  %v1632_v42 = vand.u32 2147483647, %v1626_v55  ;;  %v1640_v4 = vsub.f32 1.0, %v1634_v47 }
 0x4fd   : > { %v1624_v36 = vadd.f32 %v4187_v53, %v1130_v38  ;;  %v1649_v25 = vmax.f32 %v1643_v52, 0.0  ;;  %v1333_v7 = vpop.f32.mrb[31].mxu0  ;;  %v1667_v46 = vand.u32 2147483647, %v1661_v44  ;;  %v1633_v45 = vand.u32 2147483647, %v1627_v16 }
 0x4fe   : > { %v1664_v33 = vand.u32 2147483647, %v1658_v5  ;;  %v1629_v14 = vsub.f32 %v1623_v29, %v4206_v11  ;;  %v1646_v10 = vmax.f32 %v1640_v4, 0.0  ;;  %v1638_v11 = vsub.f32 1.0, %v1632_v42 }
 0x4ff   : > { %v1630_v23 = vsub.f32 %v1624_v36, %v4216_v30  ;;  %v1685_v48 = vmul.f32 %v2944_v41, %v1649_v25  ;;  %v1134_v28 = vpop.f32.mrb[42].mxu1  ;;  %v1673_v57 = vsub.f32 1.0, %v1667_v46  ;;  %v1639_v50 = vsub.f32 1.0, %v1633_v45 }
 0x500   : > { %v1670_v26 = vsub.f32 1.0, %v1664_v33  ;;  %v1635_v20 = vand.u32 2147483647, %v1629_v14  ;;  %v1136_v34 = vpop.f32.mrb[43].mxu1  ;;  %v1650_v53 = vadd.f32 %v4195_v62, %v1134_v28  ;;  %v1682_v35 = vmul.f32 %v1646_v10, %v1333_v7 }
 0x501   : > { %v1636_v32 = vand.u32 2147483647, %v1630_v23  ;;  %v1651_v0 = vadd.f32 %v4195_v62, %v1136_v34  ;;  %v1679_v1 = vmax.f32 %v1673_v57, 0.0  ;;  %v1644_v44 = vmax.f32 %v1638_v11, 0.0  ;;  %v3309_v57 = vpop.permute.xlu1 %3308 }
 0x502   : > { %v1676_v49 = vmax.f32 %v1670_v26, 0.0  ;;  %v1656_v63 = vsub.f32 %v1650_v53, %v4211_v17  ;;  %v1641_v16 = vsub.f32 1.0, %v1635_v20  ;;  %v1645_v29 = vmax.f32 %v1639_v50, 0.0 }
 0x503   : > { %v1657_v30 = vsub.f32 %v1651_v0, %v4221_v31  ;;  %v1140_v39 = vpop.f32.mrb[44].mxu1  ;;  %v1691_v47 = vmul.f32 %v1685_v48, %v1679_v1  ;;  %v1642_v38 = vsub.f32 1.0, %v1636_v32  ;;  %v3310_v11 = vunpack.i.l.bf16 %v3309_v57 }
 0x504   : > { %v1688_v55 = vmul.f32 %v1682_v35, %v1676_v49  ;;  %v1653_v43 = vadd.f32 %v4213_v24, %v1140_v39  ;;  %v1142_v27 = vpop.f32.mrb[45].mxu1  ;;  %v1662_v60 = vand.u32 2147483647, %v1656_v63  ;;  %v1647_v28 = vmax.f32 %v1641_v16, 0.0 }
 0x505   : > { %v1663_v52 = vand.u32 2147483647, %v1657_v30  ;;  %v1654_v62 = vadd.f32 %v4213_v24, %v1142_v27  ;;  %v4419_v46 = vadd.f32 %v1691_v47, %v4380_v22  ;;  %v1648_v34 = vmax.f32 %v1642_v38, 0.0  ;;  %v3314_v30 = vpop.permute.xlu0 %3313 }
 0x506   : > { %v1659_v5 = vsub.f32 %v1653_v43, %v4211_v17  ;;  %v4415_v41 = vadd.f32 %v1688_v55, %v4384_v8  ;;  %v1668_v42 = vsub.f32 1.0, %v1662_v60  ;;  %v3311_v35 = vunpack.i.h.bf16 %v3309_v57 }
 0x507   : > { %v1669_v36 = vsub.f32 1.0, %v1663_v52  ;;  %v1660_v25 = vsub.f32 %v1654_v62, %v4221_v31  ;;  %v1146_v7 = vpop.f32.mrb[46].mxu1  ;;  %v3315_v43 = vunpack.i.l.bf16 %v3314_v30 }
 0x508   : > { %v1665_v33 = vand.u32 2147483647, %v1659_v5  ;;  %v1680_v14 = vmul.f32 %v1644_v44, %v1146_v7  ;;  %v1148_v4 = vpop.f32.mrb[47].mxu1  ;;  %v1674_v24 = vmax.f32 %v1668_v42, 0.0  ;;  %v3118_v55 = vpack.c.bf16 %v3311_v35, %v3310_v11 }
 0x509   : > { %v1675_v45 = vmax.f32 %v1669_v36, 0.0  ;;  %v1666_v23 = vand.u32 2147483647, %v1660_v25  ;;  %v1681_v17 = vmul.f32 %v1645_v29, %v1148_v4 }
 0x50a   : > { %v1671_v48 = vsub.f32 1.0, %v1665_v33  ;;  %v1686_v26 = vmul.f32 %v1680_v14, %v1674_v24 }
 0x50b   : > { %v1672_v8 = vsub.f32 1.0, %v1666_v23  ;;  %v1687_v20 = vmul.f32 %v1681_v17, %v1675_v45  ;;  %v1152_v10 = vpop.f32.mrb[48].mxu1 }
 0x50c   : > { %v1677_v31 = vmax.f32 %v1671_v48, 0.0  ;;  %v1683_v32 = vmul.f32 %v1647_v28, %v1152_v10  ;;  %v1154_v53 = vpop.f32.mrb[49].mxu1  ;;  %v1692_v1 = vadd.f32 %v1686_v26, %v4374_v13  ;;  %v3316_v13 = vunpack.i.h.bf16 %v3314_v30 }
 0x50d   : > { %v1678_v22 = vmax.f32 %v1672_v8, 0.0  ;;  %v1684_v0 = vmul.f32 %v1648_v34, %v1154_v53  ;;  %v4423_v49 = vadd.f32 %v1687_v20, %v4377_v2 }
 0x50e   : > { %v1689_v63 = vmul.f32 %v1683_v32, %v1677_v31  ;;  %1780 = vrot.lane.b32.xlu0 %v1692_v1, %s3603_s16  ;;  %2961 = vmatprep.mubr.msk.f32.mxu0 %vm1698_vm3, %v1692_v1  ;;  %v3122_v2 = vpack.c.bf16 %v3316_v13, %v3315_v43 }
 0x50f   : > { %v1690_v39 = vmul.f32 %v1684_v0, %v1678_v22 }
 0x510   : > { %v1695_v50 = vadd.f32 %v1689_v63, %v4389_v61 }
 0x511   : > { %v4429_v47 = vadd.f32 %v1690_v39, %v4394_v6 }
 0x512   : > { %1782 = vrot.lane.b32.xlu1 %v1695_v50, %s3603_s16  ;;  %2962 = vmatmul.mubr.msk.f32.vlgmr.msra.gmra.mrb[32].mxu0 %vm1698_vm3, %v1695_v50 }
 0x513   : > { %3343 = vrot.lane.b32.xlu0 %v4249_v18, %s3602_s13  ;;  %3117 = vmatpush3.bf16.msra.mxu0 %v4304_v51 }
 0x514   : > { %3119 = vmatprep.subr.bf16.mxu0 %v3118_v55 }
 0x516   : > { %3348 = vrot.lane.b32.xlu1 %v4249_v18, %s3594_s21 }
 0x517   : > { %3353 = vrot.lane.b32.xlu0 %v4299_v58, %s3602_s13  ;;  %3121 = vmatpush3.bf16.msra.mxu0 %v3118_v55  ;;  %s3611_s13 = smov 24  }
 0x518   : > { %3123 = vmatprep.subr.bf16.mxu0 %v3122_v2 }
 0x51a   : > { %3358 = vrot.lane.b32.xlu1 %v4299_v58, %s3594_s21  ;;  %s3613_s21 = smov 32  }
 0x51b   : > { %3363 = vrot.lane.b32.xlu0 %v4154_v54, %s3604_s20  ;;  %3125 = vmatpush3.bf16.msra.mxu0 %v3122_v2 }
 0x51e   : > { %3368 = vrot.lane.b32.xlu1 %v4154_v54, %s3605_s22  ;;  %v3324_v54 = vpop.permute.xlu0 %3323 }
 0x51f   : > { %2000 = vrot.lane.b32.xlu0 %v4423_v49, %s3603_s16  ;;  %v3325_v61 = vunpack.i.l.bf16 %v3324_v54 }
 0x522   : > { %2002 = vrot.lane.b32.xlu1 %v4429_v47, %s3603_s16  ;;  %v3334_v5 = vpop.permute.xlu0 %3333 }
 0x523   : > { %3373 = vrot.lane.b32.xlu0 %v4160_v37, %s3604_s20  ;;  %v3336_v29 = vunpack.i.h.bf16 %v3334_v5  ;;  %v3335_v38 = vunpack.i.l.bf16 %v3334_v5 }
 0x525   : > { %v3134_v36 = vpack.c.bf16 %v3336_v29, %v3335_v38 }
 0x526   : > { %3378 = vrot.lane.b32.xlu1 %v4160_v37, %s3605_s22  ;;  %v3326_v37 = vunpack.i.h.bf16 %v3324_v54 }
 0x527   : > { %3383 = vrot.lane.b32.xlu0 %v4249_v18, %s3604_s20 }
 0x528   : > { %v3130_v16 = vpack.c.bf16 %v3326_v37, %v3325_v61 }
 0x52a   : > { %3388 = vrot.lane.b32.xlu1 %v4249_v18, %s3605_s22 }
 0x52b   : > { %3393 = vrot.lane.b32.xlu0 %v4299_v58, %s3604_s20 }
 0x52e   : > { %3398 = vrot.lane.b32.xlu1 %v4299_v58, %s3605_s22  ;;  %s4522_s22 = scalar_lea.hbm %s4578_s7, %s2752_s18 }
 0x52f   : > { %2212 = vrot.lane.b32.xlu0 %v4415_v41, %s3603_s16 }
 0x532   : > { %2214 = vrot.lane.b32.xlu1 %v4419_v46, %s3603_s16  ;;  %s3612_s16 = smov 16  }
 0x533   : > { %816 = vrot.lane.b32.xlu0 %v4028_v9, %s3585_s29  ;;  %v3319_v51 = vpop.permute.xlu1 %3318 }
 0x534   : > { %v3321_v6 = vunpack.i.h.bf16 %v3319_v51  ;;  %v3320_v27 = vunpack.i.l.bf16 %v3319_v51 }
 0x536   : > { %v3126_v18 = vpack.c.bf16 %v3321_v6, %v3320_v27  ;;  %818 = vrot.lane.b32.xlu1 %v4023_v40, %s3585_s29  ;;  %s3610_s29 = smov 8  }
 0x537   : > { %826 = vrot.lane.b32.xlu0 %v4068_v56, %s3586_s8  ;;  %v3329_v58 = vpop.permute.xlu1 %3328 }
 0x538   : > { %v3331_v60 = vunpack.i.h.bf16 %v3329_v58  ;;  %v3330_v52 = vunpack.i.l.bf16 %v3329_v58  ;;  %3127 = vmatprep.subr.bf16.mxu0 %v3126_v18 }
 0x539   : > { %3129 = vmatpush3.bf16.msra.mxu0 %v3126_v18 }
 0x53a   : > { %v3146_v62 = vpack.c.bf16 %v3331_v60, %v3330_v52  ;;  %828 = vrot.lane.b32.xlu1 %v4038_v15, %s3586_s8  ;;  %3131 = vmatprep.subr.bf16.mxu0 %v3130_v16 }
 0x53b   : > { %836 = vrot.lane.b32.xlu0 %v4093_v59, %s3587_s15  ;;  %v3339_v9 = vpop.permute.xlu1 %3338 }
 0x53c   : > { %v3341_v44 = vunpack.i.h.bf16 %v3339_v9  ;;  %v3340_v40 = vunpack.i.l.bf16 %v3339_v9  ;;  %3147 = vmatprep.subr.bf16.mxu1 %v3146_v62 }
 0x53d   : > { %3149 = vmatpush3.bf16.msra.mxu1 %v3146_v62 }
 0x53e   : > { %v3150_v56 = vpack.c.bf16 %v3341_v44, %v3340_v40  ;;  %838 = vrot.lane.b32.xlu1 %v4047_v21, %s3587_s15  ;;  %s3615_s15 = smov [#allocation7]  }
 0x540   : > { %3151 = vmatprep.subr.bf16.mxu1 %v3150_v56 }
 0x541   : > { %3153 = vmatpush3.bf16.msra.mxu1 %v3150_v56 }
 0x580   : > { %v1781_v42 = vpop.permute.xlu0 %1780 }
 0x581   : > { %2980 = vmatprep.mubr.msk.f32.mxu0 %vm1698_vm3, %v1781_v42 }
 0x584   : > { %v1783_v15 = vpop.permute.xlu1 %1782 }
 0x585   : > { %v3344_v59 = vpop.permute.xlu0 %3343  ;;  %2981 = vmatmul.mubr.msk.f32.vlgmr.msra.gmra.mrb[34].mxu0 %vm1698_vm3, %v1783_v15 }
 0x586   : > { %v3346_v25 = vunpack.i.h.bf16 %v3344_v59  ;;  %v3345_v7 = vunpack.i.l.bf16 %v3344_v59  ;;  %3133 = vmatpush3.bf16.msra.mxu0 %v3130_v16  ;;  %2999 = vmatprep.mubr.msk.f32.mxu0 %vm1698_vm3, %v4423_v49 }
 0x587   : > { %3135 = vmatprep.subr.bf16.mxu0 %v3134_v36 }
 0x588   : > { %v3138_v21 = vpack.c.bf16 %v3346_v25, %v3345_v7  ;;  %v3349_v33 = vpop.permute.xlu1 %3348 }
 0x589   : > { %v3351_v14 = vunpack.i.h.bf16 %v3349_v33  ;;  %v3350_v4 = vunpack.i.l.bf16 %v3349_v33  ;;  %v3354_v24 = vpop.permute.xlu0 %3353 }
 0x58a   : > { %v3356_v45 = vunpack.i.h.bf16 %v3354_v24  ;;  %v3355_v23 = vunpack.i.l.bf16 %v3354_v24  ;;  %3137 = vmatpush3.bf16.msra.mxu0 %v3134_v36 }
 0x58b   : > { %v3154_v17 = vpack.c.bf16 %v3351_v14, %v3350_v4  ;;  %3139 = vmatprep.subr.bf16.mxu0 %v3138_v21  ;;  %v3606_v14 = vmov 50   ;;  %v3609_v4 = vmov 52  }
 0x58c   : > { %v3142_v48 = vpack.c.bf16 %v3356_v45, %v3355_v23  ;;  %v3359_v28 = vpop.permute.xlu1 %3358 }
 0x58d   : > { %v3361_v57 = vunpack.i.h.bf16 %v3359_v28  ;;  %v3360_v8 = vunpack.i.l.bf16 %v3359_v28  ;;  %v3364_v26 = vpop.permute.xlu0 %3363  ;;  %3155 = vmatprep.subr.bf16.mxu1 %v3154_v17 }
 0x58e   : > { %v3366_v20 = vunpack.i.h.bf16 %v3364_v26  ;;  %v3365_v10 = vunpack.i.l.bf16 %v3364_v26  ;;  %3141 = vmatpush3.bf16.msra.mxu0 %v3138_v21  ;;  %3157 = vmatpush3.bf16.msra.mxu1 %v3154_v17 }
 0x58f   : > { %v3158_v34 = vpack.c.bf16 %v3361_v57, %v3360_v8  ;;  %3143 = vmatprep.subr.bf16.mxu0 %v3142_v48 }
 0x590   : > { %v3162_v31 = vpack.c.bf16 %v3366_v20, %v3365_v10  ;;  %v3369_v32 = vpop.permute.xlu1 %3368  ;;  %v2439_v10 = vld [vmem:[%s4577_s6 + $0x8] sm:$0xff] }
 0x591   : > { %v3371_v53 = vunpack.i.h.bf16 %v3369_v32  ;;  %v3370_v22 = vunpack.i.l.bf16 %v3369_v32  ;;  %v2001_v0 = vpop.permute.xlu0 %2000  ;;  %3159 = vmatprep.subr.bf16.mxu1 %v3158_v34  ;;  %v2441_v32 = vld [vmem:[%s4577_s6 + $0x18] sm:$0xff] }
 0x592   : > { %3145 = vmatpush3.bf16.msra.mxu0 %v3142_v48  ;;  %3018 = vmatprep.mubr.msk.f32.mxu1 %vm1698_vm3, %v2001_v0 }
 0x593   : > { %v3178_v1 = vpack.c.bf16 %v3371_v53, %v3370_v22  ;;  %3161 = vmatpush3.bf16.msra.mxu1 %v3158_v34  ;;  %3163 = vmatprep.subr.bf16.mxu0 %v3162_v31  ;;  %v2440_v34 = vld [vmem:[%s4577_s6 + $0x10] sm:$0xff] }
 0x594   : > { %v2003_v49 = vpop.permute.xlu1 %2002  ;;  %v3198_v53 = vpack.c.bf16 %v2441_v32, %v2440_v34 }
 0x595   : > { %v3374_v35 = vpop.permute.xlu0 %3373  ;;  %3000 = vmatmul.mubr.msk.f32.vlgmr.msra.gmra.mrb[36].mxu0 %vm1698_vm3, %v4429_v47  ;;  %3179 = vmatprep.subr.bf16.mxu1 %v3178_v1 }
 0x596   : > { %v3376_v11 = vunpack.i.h.bf16 %v3374_v35  ;;  %v3375_v63 = vunpack.i.l.bf16 %v3374_v35  ;;  %3019 = vmatmul.mubr.msk.f32.vlgmr.msra.gmra.mrb[50].mxu1 %vm1698_vm3, %v2003_v49  ;;  %3165 = vmatpush3.bf16.msra.mxu0 %v3162_v31 }
 0x597   : > { %3037 = vmatprep.mubr.msk.f32.mxu0 %vm1698_vm3, %v4415_v41  ;;  %3181 = vmatpush3.bf16.msra.mxu1 %v3178_v1 }
 0x598   : > { %v3166_v30 = vpack.c.bf16 %v3376_v11, %v3375_v63  ;;  %v3379_v39 = vpop.permute.xlu1 %3378 }
 0x599   : > { %v3381_v50 = vunpack.i.h.bf16 %v3379_v39  ;;  %v3380_v55 = vunpack.i.l.bf16 %v3379_v39  ;;  %v3384_v13 = vpop.permute.xlu0 %3383 }
 0x59a   : > { %v3386_v43 = vunpack.i.h.bf16 %v3384_v13  ;;  %v3385_v2 = vunpack.i.l.bf16 %v3384_v13  ;;  %3167 = vmatprep.subr.bf16.mxu0 %v3166_v30  ;;  %v2443_v13 = vld [vmem:[%s4577_s6 + $0x28] sm:$0xff] }
 0x59b   : > { %v3182_v54 = vpack.c.bf16 %v3381_v50, %v3380_v55  ;;  %3169 = vmatpush3.bf16.msra.mxu0 %v3166_v30  ;;  %v2442_v55 = vld [vmem:[%s4577_s6 + $0x20] sm:$0xff] }
 0x59c   : > { %v3170_v47 = vpack.c.bf16 %v3386_v43, %v3385_v2  ;;  %v3389_v51 = vpop.permute.xlu1 %3388  ;;  %v3202_v2 = vpack.c.bf16 %v2443_v13, %v2442_v55 }
 0x59d   : > { %v3391_v37 = vunpack.i.h.bf16 %v3389_v51  ;;  %v3390_v61 = vunpack.i.l.bf16 %v3389_v51  ;;  %v3394_v6 = vpop.permute.xlu0 %3393  ;;  %3183 = vmatprep.subr.bf16.mxu1 %v3182_v54 }
 0x59e   : > { %v3396_v27 = vunpack.i.h.bf16 %v3394_v6  ;;  %v3395_v18 = vunpack.i.l.bf16 %v3394_v6  ;;  %3171 = vmatprep.subr.bf16.mxu0 %v3170_v47  ;;  %3185 = vmatpush3.bf16.msra.mxu1 %v3182_v54 }
 0x59f   : > { %v3186_v41 = vpack.c.bf16 %v3391_v37, %v3390_v61  ;;  %3173 = vmatpush3.bf16.msra.mxu0 %v3170_v47 }
 0x5a0   : > { %v3174_v58 = vpack.c.bf16 %v3396_v27, %v3395_v18  ;;  %v3399_v16 = vpop.permute.xlu1 %3398 }
 0x5a1   : > { %v3401_v60 = vunpack.i.h.bf16 %v3399_v16  ;;  %v3400_v52 = vunpack.i.l.bf16 %v3399_v16  ;;  %v2213_v62 = vpop.permute.xlu0 %2212  ;;  %3187 = vmatprep.subr.bf16.mxu1 %v3186_v41 }
 0x5a2   : > { %3175 = vmatprep.subr.bf16.mxu0 %v3174_v58  ;;  %3056 = vmatprep.mubr.msk.f32.mxu1 %vm1698_vm3, %v2213_v62 }
 0x5a3   : > { %v3190_v9 = vpack.c.bf16 %v3401_v60, %v3400_v52  ;;  %3177 = vmatpush3.bf16.msra.mxu0 %v3174_v58  ;;  %3189 = vmatpush3.bf16.msra.mxu1 %v3186_v41 }
 0x5a4   : > { %v2215_v44 = vpop.permute.xlu1 %2214 }
 0x5a5   : > { %v817_v40 = vpop.permute.xlu0 %816  ;;  %3191 = vmatprep.subr.bf16.mxu1 %v3190_v9 }
 0x5a6   : > { %3038 = vmatmul.mubr.msk.f32.vlgmr.msra.gmra.mrb[38].mxu0 %vm1698_vm3, %v4419_v46  ;;  %v822_v29 = vadd.f32 %v3983_v19, %v817_v40  ;;  %v3607_v19 = vmov 51  }
 0x5a7   : > { %3193 = vmatpush3.bf16.msra.mxu1 %v3190_v9 }
 0x5a8   : > { %v819_v56 = vpop.permute.xlu1 %818 }
 0x5a9   : > { %v827_v5 = vpop.permute.xlu0 %826  ;;  %v823_v15 = vadd.f32 %v3979_v12, %v819_v56  ;;  %v3608_v12 = vmov 53  }
 0x5aa   : > { %3057 = vmatmul.mubr.msk.f32.vlgmr.msra.gmra.mrb[52].mxu1 %vm1698_vm3, %v2215_v44  ;;  %v832_v38 = vadd.f32 %v827_v5, %v822_v29 }
 0x5ac   : > { %v829_v42 = vpop.permute.xlu1 %828 }
 0x5ad   : > { %v837_v36 = vpop.permute.xlu0 %836  ;;  %v833_v25 = vadd.f32 %v829_v42, %v823_v15 }
 0x5ae   : > { %v842_v59 = vadd.f32 %v837_v36, %v832_v38 }
 0x5b0   : > { %3448 = vrcp.f32 %v842_v59  ;;  %v839_v7 = vpop.permute.xlu1 %838 }
 0x5b1   : > { %v843_v21 = vadd.f32 %v839_v7, %v833_v25 }
 0x5b3   : > { %3450 = vrcp.f32 %v843_v21 }
 0x5ba   : > { %v3449_v33 = vpop.eup %3448 }
 0x5bb   : > { %2334 = vperm.xlu0 %3301, %v3449_v33  }
 0x5bd   : > { %v3451_v46 = vpop.eup %3450 }
 0x5be   : > { %2338 = vperm.xlu1 %3300, %v3451_v46  }
 0x5bf   : > { %3402 = vset.pattern.permute.xlu0 %v3606_v14 }
 0x5c0   : > { %2344 = vperm.xlu0 %3402, %v3449_v33  }
 0x5c2   : > { %3403 = vset.pattern.permute.xlu1 %v3606_v14 }
 0x5c3   : > { %2348 = vperm.xlu1 %3403, %v3451_v46  }
 0x5c4   : > { %3405 = vset.pattern.permute.xlu0 %v3607_v19 }
 0x5c5   : > { %2358 = vperm.xlu0 %3405, %v3451_v46  }
 0x5c7   : > { %3404 = vset.pattern.permute.xlu1 %v3607_v19 }
 0x5c8   : > { %2354 = vperm.xlu1 %3404, %v3449_v33  }
 0x5c9   : > { %3407 = vset.pattern.permute.xlu0 %v3608_v12 }
 0x5ca   : > { %2374 = vperm.xlu0 %3407, %v3449_v33  }
 0x5cc   : > { %3406 = vset.pattern.permute.xlu1 %v3609_v4 }
 0x5cd   : > { %2364 = vperm.xlu1 %3406, %v3449_v33  }
 0x5ce   : > { %3410 = vset.pattern.permute.xlu0 %v3591_v3 }
 0x5cf   : > { %2328 = vperm.xlu0 %3410, %v3451_v46  }
 0x5d1   : > { %2368 = vperm.xlu1 %3406, %v3451_v46  }
 0x5d3   : > { %3411 = vset.pattern.permute.xlu0 %v3608_v12 }
 0x5d5   : > { %3408 = vset.pattern.permute.xlu1 %v3608_v12 }
 0x5d6   : > { %2378 = vperm.xlu1 %3408, %v3451_v46  }
 0x5da   : > { %3409 = vset.pattern.permute.xlu1 %v3591_v3  ;;  %v2438_v3 = vld [vmem:[%s4577_s6] sm:$0xff] }
 0x5db   : > { %2323 = vperm.xlu1 %3409, %v3449_v33   ;;  %v3194_v31 = vpack.c.bf16 %v2439_v10, %v2438_v3  ;;  %v3453_v10 = vld [vmem:[%s3781_s19] sm:$0xff] }
 0x5dd   : > { %3195 = vmatprep.subr.bf16.mxu0 %v3194_v31 }
 0x5de   : > { %3197 = vmatpush3.bf16.msra.mxu0 %v3194_v31 }
 0x5df   : > { %3199 = vmatprep.subr.bf16.mxu0 %v3198_v53 }
 0x5e2   : > { %3201 = vmatpush3.bf16.msra.mxu0 %v3198_v53 }
 0x5e3   : > { %3203 = vmatprep.subr.bf16.mxu0 %v3202_v2 }
 0x5e5   : > { %v4488_v24 = vpop.f32.mrb[32].mxu0 }
 0x5e6   : > { %v4490_v45 = vpop.f32.mrb[33].mxu0  ;;  %3205 = vmatpush3.bf16.msra.mxu0 %v3202_v2 }
 0x63a   : > { %v2335_v57 = vpop.permute.xlu0 %2334 }
 0x63d   : > { %v2339_v23 = vpop.permute.xlu1 %2338 }
 0x63f   : > { %v2345_v26 = vpop.permute.xlu0 %2344 }
 0x642   : > { %v2349_v20 = vpop.permute.xlu1 %2348 }
 0x644   : > { %v2359_v22 = vpop.permute.xlu0 %2358 }
 0x647   : > { %v2355_v35 = vpop.permute.xlu1 %2354 }
 0x649   : > { %v2375_v18 = vpop.permute.xlu0 %2374 }
 0x64c   : > { %v2365_v43 = vpop.permute.xlu1 %2364 }
 0x64e   : > { %v2329_v9 = vpop.permute.xlu0 %2328 }
 0x64f   : > { %v2332_v38 = vmul.f32 %v4488_v24, %v2329_v9  ;;  %v2743_v24 = vld [vmem:[#allocation2 + $0x5] ss:$0 sm:$0xff] }
 0x650   : > { %v2369_v54 = vpop.permute.xlu1 %2368 }
 0x655   : > { %v2379_v6 = vpop.permute.xlu1 %2378 }
 0x658   : > { %v2982_v17 = vpop.f32.mrb[34].mxu0 }
 0x659   : > { %v2342_v48 = vmul.f32 %v2982_v17, %v2339_v23  ;;  %v1886_v28 = vpop.f32.mrb[35].mxu0  ;;  %v2746_v23 = vld [vmem:[#allocation2 + $0x6] ss:$0 sm:$0xff] }
 0x65a   : > { %v2341_v8 = vmul.f32 %v2335_v57, %v1886_v28  ;;  %v2324_v60 = vpop.permute.xlu1 %2323 }
 0x65b   : > { %2387 = vrot.lane.b32.xlu1 %v2342_v48, %s3610_s29  ;;  %v2331_v29 = vmul.f32 %v2324_v60, %v4490_v45 }
 0x65f   : > { %2385 = vrot.lane.b32.xlu1 %v2341_v8, %s3610_s29 }
 0x668   : > { %v3001_v0 = vpop.f32.mrb[36].mxu0 }
 0x669   : > { %v1991_v1 = vpop.f32.mrb[37].mxu0  ;;  %v3020_v49 = vpop.f32.mrb[50].mxu1  ;;  %v2352_v39 = vmul.f32 %v3001_v0, %v2349_v20  ;;  %v3452_v20 = vld [vmem:[%s3781_s19 + $0x8] sm:$0xff] }
 0x66a   : > { %v2362_v11 = vmul.f32 %v3020_v49, %v2359_v22  ;;  %v2098_v63 = vpop.f32.mrb[51].mxu1  ;;  %v2351_v50 = vmul.f32 %v2345_v26, %v1991_v1 }
 0x66b   : > { %v2361_v30 = vmul.f32 %v2355_v35, %v2098_v63 }
 0x66c   : > { %2403 = vrot.lane.b32.xlu1 %v2362_v11, %s3611_s13 }
 0x66d   : > { %2401 = vrot.lane.b32.xlu0 %v2361_v30, %s3611_s13  ;;  %s2553_s13 = sshll.u32 %s314_s17, 4  ;;  %s4525_s13 = int_to_ptr.vmem [resolvable:$true] %s2553_s13 }
 0x66e   : > { %s3510_s8 = scalar_lea.vmem %s4525_s13, 256 }
 0x66f   : > { %p3511_p1 = scmp.ne.s32.totalorder %s4525_s13, %s3510_s8 }
 0x670   : > { %2395 = vrot.lane.b32.xlu1 %v2352_v39, %s3612_s16 }
 0x671   : > { %2393 = vrot.lane.b32.xlu0 %v2351_v50, %s3612_s16  ;;  %p3512_p3 = pnand %p3511_p1, %p4591_p2 }
 0x673   : > { %p3513_p4 = pneg %p3512_p3 }
 0x679   : > { %v3039_v47 = vpop.f32.mrb[38].mxu0 }
 0x67a   : > { %v2372_v51 = vmul.f32 %v3039_v47, %v2369_v54  ;;  %v2203_v37 = vpop.f32.mrb[39].mxu0 }
 0x67b   : > { %v2371_v61 = vmul.f32 %v2365_v43, %v2203_v37 }
 0x67c   : > { %2411 = vrot.lane.b32.xlu1 %v2372_v51, %s3613_s21 }
 0x67d   : > { %v3058_v27 = vpop.f32.mrb[52].mxu1  ;;  %2409 = vrot.lane.b32.xlu0 %v2371_v61, %s3613_s21  ;;  %s3514_s21 = sshll.u32 %s3615_s15, 4  ;;  %s3515_s21 = int_to_ptr.vmem [resolvable:$false] %s3514_s21 }
 0x67e   : > { %v2382_v41 = vmul.f32 %v3058_v27, %v2379_v6  ;;  %v2310_v58 = vpop.f32.mrb[53].mxu1  ;;  %s3516_s19 = scalar_lea.vmem %s3515_s21, 512  ;;  %p3517_p7 = scmp.lt.s32.totalorder %s4525_s13, %s3515_s21 }
 0x67f   : > { %v2381_v16 = vmul.f32 %v2375_v18, %v2310_v58  ;;  %p3518_p8 = scmp.lt.s32.totalorder %s3516_s19, %s3510_s8 }
 0x680   : > { %2419 = vrot.lane.b32.xlu1 %v2382_v41, %s3614_s23 }
 0x681   : > { %2417 = vrot.lane.b32.xlu0 %v2381_v16, %s3614_s23  ;;  %p3519_p11 = por %p3518_p8, %p3517_p7 }
 0x683   : > { %p3520_p13 = pnand %p3519_p11, %p3513_p4 }
 0x6cd   : > { %v2388_v52 = vpop.permute.xlu1 %2387 }
 0x6ce   : > { %v2425_v36 = vsel %vm2423_vm4, %v2332_v38, %v2388_v52 }
 0x6d1   : > { %v2386_v62 = vpop.permute.xlu1 %2385 }
 0x6d2   : > { %v2424_v42 = vsel %vm2423_vm4, %v2331_v29, %v2386_v62 }
 0x6de   : > { %v2404_v44 = vpop.permute.xlu1 %2403 }
 0x6df   : > { %v2402_v40 = vpop.permute.xlu0 %2401 }
 0x6e2   : > { %v2396_v56 = vpop.permute.xlu1 %2395 }
 0x6e3   : > { %v2394_v5 = vpop.permute.xlu0 %2393  ;;  %v2428_v7 = vsel %vm2426_vm5, %v2425_v36, %v2396_v56 }
 0x6e4   : > { %v2427_v59 = vsel %vm2426_vm5, %v2424_v42, %v2394_v5  ;;  %v2431_v46 = vsel %vm2429_vm6, %v2428_v7, %v2404_v44 }
 0x6e5   : > { %v2430_v21 = vsel %vm2429_vm6, %v2427_v59, %v2402_v40 }
 0x6ee   : > { %v2412_v15 = vpop.permute.xlu1 %2411 }
 0x6ef   : > { %v2410_v25 = vpop.permute.xlu0 %2409  ;;  %v2434_v12 = vsel %vm2432_vm7, %v2431_v46, %v2412_v15 }
 0x6f0   : > { %v2433_v14 = vsel %vm2432_vm7, %v2430_v21, %v2410_v25 }
 0x6f2   : > { %v2420_v33 = vpop.permute.xlu1 %2419 }
 0x6f3   : > { %v2418_v19 = vpop.permute.xlu0 %2417  ;;  %v2437_v45 = vsel %vm2435_vm8, %v2434_v12, %v2420_v33 }
 0x6f4   : > { %v2436_v4 = vsel %vm2435_vm8, %v2433_v14, %v2418_v19 }
 0x6f5   : > { %3071 = vmatprep.mubr.msk.f32.mxu0 %vm346_vm0, %v2436_v4 }
 0x6f6   : > { %3072 = vmatmul.mubr.msk.f32.vlgmr.msra.gmra.mrb[40].mxu0 %vm346_vm0, %v2437_v45 }
 0x7c9   : > { %v3073_v17 = vpop.f32.mrb[40].mxu0 }
 0x7ca   : > { %v2526_v48 = vadd.f32 %v3073_v17, %v2743_v24  ;;  %v2520_v28 = vpop.f32.mrb[41].mxu0 }
 0x7cb   : > { %v2521_v57 = vadd.f32 %v2743_v24, %v2520_v28 }
 0x7cc   : > { %v2534_v8 = vmul.f32 %v2746_v23, %v2526_v48 }
 0x7cd   : > { %v2533_v26 = vmul.f32 %v2746_v23, %v2521_v57 }
 0x7ce   : > { %v2536_v3 = vadd.f32 %v3452_v20, %v2534_v8 }
 0x7cf   : > { %v2535_v34 = vadd.f32 %v3453_v10, %v2533_v26 }
 0x7d0   : > { %2538 = vst.msk [vmem:[%s314_s17 + $0x8] sm:$0xff] %vm346_vm0, %v2536_v3 }
 0x7d1   : > { %2537 = vst.msk [vmem:[%s314_s17] sm:$0xff] %vm346_vm0, %v2535_v34 }
 0x7d2   : > { %3523 = shalt.err (!%p3520_p13)
}
 0x7d3   : > { %s3524_s23 = scalar_lea.hbm %s4522_s22, 256  ;;  %s3528_s18 = scalar_lea.hbm %s4578_s7, 512 }
 0x7d4   : > { %p3525_p6 = scmp.ne.s32.totalorder %s4522_s22, %s3524_s23  ;;  %p3529_p9 = scmp.lt.u32.totalorder %s4522_s22, %s4578_s7 }
 0x7d5   : > { %p3530_p10 = scmp.lt.u32.totalorder %s3528_s18, %s3524_s23  ;;  %p3532_p1 = scmp.lt.u32.totalorder %s3524_s23, %s4522_s22 }
 0x7d6   : > { %p3526_p0 = pnand %p3525_p6, %p4591_p2 }
 0x7d7   : > { %p3531_p12 = por %p3530_p10, %p3529_p9 }
 0x7d8   : > { %p3527_p5 = pneg %p3526_p0 }
 0x7d9   : > { %p3533_p3 = por %p3532_p1, %p3531_p12 }
 0x7db   : > { %p3534_p4 = pnand %p3533_p3, %p3527_p5 }
 0x7dd   : > { %3537 = shalt.err (!%p3534_p4)
}
 0x7de   : > { %s3616_s20 = smov 128  }
 0x7df   : > { %3214 = dma.vmem_to_hbm [thread:$0]  (%p4591_p2), %s4525_s13, 256, %s4522_s22, %s4529_s28, %s3616_s20, %s3616_s20, %s3610_s29  }
 0x7e0 PF: > { %p3231_p7 = scmp.ge.s32.totalorder %s3580_s27, 2  ;;  %s2568_s8 = sand.u32 1, %s3568_s24  }
 0x7e1   : > { %p4592_p8 = scmp.ne.s32.totalorder %s4583_s12, 0  ;;  %s2569_s15 = scalar_lea.sflag [#allocation4], %s2568_s8 }
 0x7e3   : > { %p3224_p11 = pnand %p3231_p7, %p4592_p8 }
 0x7e5   : > { %3563 = dma.done.wait (!%p3224_p11), %s2569_s15, 256  }
 0x7e6   : > { %3565 = vsyncadd (!%p3224_p11), %s2569_s15, 4294967040  ;;  %p19_p13 = scmp.ge.s32.totalorder %s3682_s30, 4   ;;  %s4593_s24 = smov %s3572_s25 }
 0x7e7   : > { %s4594_s25 = smov %s3576_s26  ;;  %s4595_s26 = smov %s3693_s10 }
 0x7e8   : > { %s4596_s27 = smov %s3682_s30  ;;  %21 = sbr.rel (!%p19_p13) target bundleno = 5 (0x5), region = 97 }
 0x7ef   :  { %2574 = vsyncpa [#allocation3], 1 }
 0x7f0   :  { %2576 = vsyncpa [#allocation3 + $0x1], 1 }
 0x7f1   :  { %2577 = vsyncpa [#allocation6], 1 }
 0x7f2   :  { %2578 = vsyncpa [#allocation4], 1 }
 0x7f3   :  { %2580 = vsyncpa [#allocation4 + $0x1], 1 }

</bundles_post_ra>
